<compile_context>
chip_gen: v7x
topology: tpu7x:2x2x1
jax: 0.10.0
libtpu: 0.0.40
codegen_flags: <defaults>
</compile_context>

<pallas_src>
import functools

import jax
import jax.numpy as jnp
from jax.experimental import pallas as pl
from jax.experimental.pallas import tpu as pltpu


# ----------------------------------------------------------------------------
# Fused per-image kernel:
#   temporal mean -> concat(slow, fast) -> ROIAlign matmul -> max over bins
#   -> fc1+relu -> fc2+relu -> predictor -> sigmoid
# ----------------------------------------------------------------------------
def _action_head_kernel(slow_ref, fast_ref, w_ref,
                        w1_ref, b1_ref, w2_ref, b2_ref, wc_ref, bc_ref,
                        pooled_ref, logits_ref, scores_ref, *, nb, r2):
    # slow_ref: (1, Cs, Ts, HW) f32 ; fast_ref: (1, Cf, Tf, HW) f32
    # w_ref   : (1, r2*nb, HW) bf16 bin-major stacked bilinear weights
    s = jnp.mean(slow_ref[0], axis=1)                      # (Cs, HW)
    f = jnp.mean(fast_ref[0], axis=1)                      # (Cf, HW)
    # aligned sublane concat (Cs is a multiple of 8), keep features (C, HW)
    feat = jnp.concatenate([s, f], axis=0).astype(jnp.bfloat16)   # (C, HW)

    # ROIAlign for every box/bin of this image in ONE matmul (A·Bᵀ form).
    roi = jax.lax.dot_general(
        w_ref[0], feat,
        dimension_numbers=(((1,), (1,)), ((), ())),
        preferred_element_type=jnp.float32)                # (r2*nb, C)

    # spatial max pool over the r2 ROI bins (bin-major rows -> VPU maximums)
    pooled = roi[0:nb]
    for r in range(1, r2):
        pooled = jnp.maximum(pooled, roi[r * nb:(r + 1) * nb])
    pooled_ref[0] = pooled                                 # (nb, C) person features

    # fc1 + relu, fc2 + relu  (feature extractor MLP)
    h = jnp.maximum(
        jnp.dot(pooled, w1_ref[...], preferred_element_type=jnp.float32)
        + b1_ref[...], 0.0)
    h = jnp.maximum(
        jnp.dot(h, w2_ref[...], preferred_element_type=jnp.float32)
        + b2_ref[...], 0.0)
    # predictor linear + sigmoid post-processing
    logits = jnp.dot(h, wc_ref[...], preferred_element_type=jnp.float32) + bc_ref[...]
    logits_ref[0] = logits
    scores_ref[0] = jax.nn.sigmoid(logits)


# ----------------------------------------------------------------------------
# Glue: box extension (BoxList.extend) and ROIAlign bilinear weight matrix.
# ----------------------------------------------------------------------------
def extend_boxes(boxes, scale, crop_size):
    sx, sy = scale
    x1, y1, x2, y2 = boxes[:, 0], boxes[:, 1], boxes[:, 2], boxes[:, 3]
    bw = x2 - x1 + 1.0
    bh = y2 - y1 + 1.0
    padw = sx * bw / 2.0
    padh = sy * bh / 2.0
    lo, hi = 0.0, crop_size - 1.0
    return jnp.stack([
        jnp.clip(x1 - padw, lo, hi),
        jnp.clip(y1 - padh, lo, hi),
        jnp.clip(x2 + padw, lo, hi),
        jnp.clip(y2 + padh, lo, hi),
    ], axis=-1)


def make_roi_weights(boxes, spatial_scale, R, H, W):
    """(N, R*R, H*W) bilinear interpolation weights, 1 sample per ROI bin."""
    # TODO(synk): ROIAlign sampling_ratio > 1 (multi-sample average per bin) not modeled.
    bx1 = boxes[:, 0] * spatial_scale
    by1 = boxes[:, 1] * spatial_scale
    bx2 = boxes[:, 2] * spatial_scale
    by2 = boxes[:, 3] * spatial_scale
    roi_w = jnp.maximum(bx2 - bx1, 1.0)
    roi_h = jnp.maximum(by2 - by1, 1.0)
    bin_w = roi_w / R
    bin_h = roi_h / R
    iy, ix = jnp.meshgrid(jnp.arange(R, dtype=jnp.float32),
                          jnp.arange(R, dtype=jnp.float32), indexing="ij")
    sx = bx1[:, None, None] + (ix[None] + 0.5) * bin_w[:, None, None]   # (N,R,R)
    sy = by1[:, None, None] + (iy[None] + 0.5) * bin_h[:, None, None]
    sx = jnp.clip(sx, 0.0, W - 1.0)
    sy = jnp.clip(sy, 0.0, H - 1.0)
    x0 = jnp.floor(sx)
    y0 = jnp.floor(sy)
    x1 = jnp.minimum(x0 + 1.0, W - 1.0)
    y1 = jnp.minimum(y0 + 1.0, H - 1.0)
    lx, ly = sx - x0, sy - y0
    hx, hy = 1.0 - lx, 1.0 - ly

    def scatter(yy, xx, ww):
        oy = jax.nn.one_hot(yy.astype(jnp.int32), H, dtype=jnp.float32)  # (N,R,R,H)
        ox = jax.nn.one_hot(xx.astype(jnp.int32), W, dtype=jnp.float32)  # (N,R,R,W)
        return ww[..., None, None] * (oy[..., :, None] * ox[..., None, :])

    wmat = (scatter(y0, x0, hy * hx) + scatter(y0, x1, hy * lx)
            + scatter(y1, x0, ly * hx) + scatter(y1, x1, ly * lx))
    return wmat.reshape(boxes.shape[0], R * R, H * W)


# ----------------------------------------------------------------------------
# Full ROIActionHead forward (eval path).
# ----------------------------------------------------------------------------
def roi_action_head_forward(slow, fast, boxes, box_batch_idx, params,
                            crop_size, test_ext, resolution, boxes_per_image):
    B, Cs, Ts, H, W = slow.shape
    _, Cf, Tf, _, _ = fast.shape
    HW = H * W
    C = Cs + Cf
    N = boxes.shape[0]
    R = resolution
    R2 = R * R
    NB = int(boxes_per_image)
    NB_k = max(8, ((NB + 7) // 8) * 8)          # sublane-aligned boxes-per-image

    # proposals = [box.extend(self.test_ext) for box in boxes]
    ext_boxes = extend_boxes(boxes, test_ext, crop_size)

    # Per-box bilinear weights, then stack all boxes of an image bin-major:
    # row index inside an image block = bin * NB_k + within_image_box_position.
    spatial_scale = H / float(crop_size)
    w_box = make_roi_weights(ext_boxes, spatial_scale, R, H, W)     # (N, R2, HW)
    oh = jax.nn.one_hot(box_batch_idx, B, dtype=jnp.int32)          # (N, B)
    pos = jnp.take_along_axis(jnp.cumsum(oh, axis=0),
                              box_batch_idx[:, None], axis=1)[:, 0] - 1
    # TODO(synk): boxes_per_image must be >= the true max boxes in any image.
    w_stack = jnp.zeros((B, R2, NB_k, HW), jnp.float32)
    w_stack = w_stack.at[box_batch_idx, :, pos, :].set(w_box)
    w_stack = w_stack.reshape(B, R2 * NB_k, HW).astype(jnp.bfloat16)

    # Pad the class dimension to a lane-aligned width for dense stores.
    NC = params["wc"].shape[1]
    NC_pad = ((NC + 127) // 128) * 128
    wc = jnp.pad(params["wc"], ((0, 0), (0, NC_pad - NC)))
    bc = jnp.pad(params["bc"], ((0, 0), (0, NC_pad - NC)))
    Drep = params["w1"].shape[1]

    slow4 = slow.reshape(B, Cs, Ts, HW)
    fast4 = fast.reshape(B, Cf, Tf, HW)

    # TODO(synk): at production channel counts (C~2048) the per-image feature
    # block should additionally be tiled over C to fit v7x's 64 MiB VMEM.
    kernel = functools.partial(_action_head_kernel, nb=NB_k, r2=R2)
    pooled_img, logits_img, scores_img = pl.pallas_call(
        kernel,
        out_shape=(
            jax.ShapeDtypeStruct((B, NB_k, C), jnp.float32),       # person features
            jax.ShapeDtypeStruct((B, NB_k, NC_pad), jnp.float32),  # action logits
            jax.ShapeDtypeStruct((B, NB_k, NC_pad), jnp.float32),  # sigmoid scores
        ),
        grid=(B,),
        in_specs=[
            pl.BlockSpec((1, Cs, Ts, HW), lambda b: (b, 0, 0, 0)),
            pl.BlockSpec((1, Cf, Tf, HW), lambda b: (b, 0, 0, 0)),
            pl.BlockSpec((1, R2 * NB_k, HW), lambda b: (b, 0, 0)),
            pl.BlockSpec((C, Drep), lambda b: (0, 0)),
            pl.BlockSpec((1, Drep), lambda b: (0, 0)),
            pl.BlockSpec((Drep, Drep), lambda b: (0, 0)),
            pl.BlockSpec((1, Drep), lambda b: (0, 0)),
            pl.BlockSpec((Drep, NC_pad), lambda b: (0, 0)),
            pl.BlockSpec((1, NC_pad), lambda b: (0, 0)),
        ],
        out_specs=[
            pl.BlockSpec((1, NB_k, C), lambda b: (b, 0, 0)),
            pl.BlockSpec((1, NB_k, NC_pad), lambda b: (b, 0, 0)),
            pl.BlockSpec((1, NB_k, NC_pad), lambda b: (b, 0, 0)),
        ],
        compiler_params=pltpu.CompilerParams(dimension_semantics=("parallel",)),
    )(slow4, fast4, w_stack,
      params["w1"], params["b1"], params["w2"], params["b2"], wc, bc)

    # Gather per-box rows back into the original (N, ...) ordering, drop padding.
    person_features = pooled_img[box_batch_idx, pos]                # (N, C)
    action_logits = logits_img[box_batch_idx, pos, :NC]             # (N, NC)
    scores = scores_img[box_batch_idx, pos, :NC]                    # (N, NC)

    # prepare_pooled_feature / post_processor bookkeeping (BoxList glue)
    # TODO(synk): interaction-aggregation (IA) / object branch and predictor
    # dropout (identity at eval) are not modeled.
    pooled_feature = {"boxes": boxes, "pooled_feature": person_features}
    result = {"boxes": boxes, "scores": scores}
    return result, action_logits, pooled_feature


def init_params(key, d_in, d_rep, n_cls):
    k1, k2, k3 = jax.random.split(key, 3)
    s = 0.05
    return {
        "w1": s * jax.random.normal(k1, (d_in, d_rep), jnp.float32),
        "b1": jnp.zeros((1, d_rep), jnp.float32),
        "w2": s * jax.random.normal(k2, (d_rep, d_rep), jnp.float32),
        "b2": jnp.zeros((1, d_rep), jnp.float32),
        "wc": s * jax.random.normal(k3, (d_rep, n_cls), jnp.float32),
        "bc": jnp.zeros((1, n_cls), jnp.float32),
    }


if __name__ == "__main__":
    key = jax.random.PRNGKey(0)
    B = 2                      # clips
    C_SLOW, C_FAST = 16, 8     # slow/fast pathway channels
    T_SLOW, T_FAST = 4, 8      # temporal extents
    H = W = 16                 # feature-map spatial size
    CROP_SIZE = 64             # cfg.DATALOADER.CROP_SIZE
    TEST_EXT = (0.1, 0.05)     # cfg.TEST.EXTEND_SCALE
    RESOLUTION = 4             # ROIAlign output resolution (R x R bins)
    N_BOXES = 8                # 4 person boxes per clip
    D_REP = 32                 # feature-extractor representation size
    NUM_CLASSES = 10           # action classes

    ks = jax.random.split(key, 6)
    slow = jax.random.normal(ks[0], (B, C_SLOW, T_SLOW, H, W), jnp.float32)
    fast = jax.random.normal(ks[1], (B, C_FAST, T_FAST, H, W), jnp.float32)
    ctr = jax.random.uniform(ks[2], (N_BOXES, 2), minval=12.0, maxval=52.0)
    wh = jax.random.uniform(ks[3], (N_BOXES, 2), minval=8.0, maxval=20.0)
    boxes = jnp.concatenate([ctr - wh / 2.0, ctr + wh / 2.0], axis=-1)  # xyxy pixels
    box_batch_idx = jnp.array([0, 0, 0, 0, 1, 1, 1, 1], jnp.int32)

    params = init_params(ks[4], C_SLOW + C_FAST, D_REP, NUM_CLASSES)

    result, action_logits, pooled_feature = roi_action_head_forward(
        slow, fast, boxes, box_batch_idx, params,
        crop_size=CROP_SIZE, test_ext=TEST_EXT, resolution=RESOLUTION,
        boxes_per_image=N_BOXES // B)

    jax.block_until_ready((result["scores"], action_logits,
                           pooled_feature["pooled_feature"]))
    assert result["scores"].shape == (N_BOXES, NUM_CLASSES)
    assert action_logits.shape == (N_BOXES, NUM_CLASSES)
    assert pooled_feature["pooled_feature"].shape == (N_BOXES, C_SLOW + C_FAST)
    print("KERNEL_OK")
</pallas_src>

<mosaic_0001>
module attributes {stable_mosaic.version = 11 : i64} {
  func.func @_action_head_kernel(%arg0: i32, %arg1: memref<1x16x4x256xf32, #tpu.memory_space<vmem>>, %arg2: memref<1x8x8x256xf32, #tpu.memory_space<vmem>>, %arg3: memref<1x128x256xbf16, #tpu.memory_space<vmem>>, %arg4: memref<24x32xf32, #tpu.memory_space<vmem>>, %arg5: memref<1x32xf32, #tpu.memory_space<vmem>>, %arg6: memref<32x32xf32, #tpu.memory_space<vmem>>, %arg7: memref<1x32xf32, #tpu.memory_space<vmem>>, %arg8: memref<32x128xf32, #tpu.memory_space<vmem>>, %arg9: memref<1x128xf32, #tpu.memory_space<vmem>>, %arg10: memref<1x8x24xf32, #tpu.memory_space<vmem>>, %arg11: memref<1x8x128xf32, #tpu.memory_space<vmem>>, %arg12: memref<1x8x128xf32, #tpu.memory_space<vmem>>) attributes {dimension_semantics = [#tpu.dimension_semantics<parallel>], iteration_bounds = array<i64: 2>, scalar_prefetch = 0 : i64, scratch_operands = 0 : i64, tpu.core_type = #tpu.core_type<tc>, window_params = [{transform_indices = @transform_0, window_bounds = array<i64: 1, 16, 4, 256>}, {transform_indices = @transform_1, window_bounds = array<i64: 1, 8, 8, 256>}, {transform_indices = @transform_2, window_bounds = array<i64: 1, 128, 256>}, {pipeline_mode = #tpu.pipeline_mode<synchronous>, transform_indices = @transform_3, window_bounds = array<i64: 24, 32>}, {pipeline_mode = #tpu.pipeline_mode<synchronous>, transform_indices = @transform_4, window_bounds = array<i64: 1, 32>}, {pipeline_mode = #tpu.pipeline_mode<synchronous>, transform_indices = @transform_5, window_bounds = array<i64: 32, 32>}, {pipeline_mode = #tpu.pipeline_mode<synchronous>, transform_indices = @transform_6, window_bounds = array<i64: 1, 32>}, {pipeline_mode = #tpu.pipeline_mode<synchronous>, transform_indices = @transform_7, window_bounds = array<i64: 32, 128>}, {pipeline_mode = #tpu.pipeline_mode<synchronous>, transform_indices = @transform_8, window_bounds = array<i64: 1, 128>}, {transform_indices = @transform_9, window_bounds = array<i64: 1, 8, 24>}, {transform_indices = @transform_10, window_bounds = array<i64: 1, 8, 128>}, {transform_indices = @transform_11, window_bounds = array<i64: 1, 8, 128>}]} {
    %c0 = arith.constant 0 : index
    %c0_0 = arith.constant 0 : index
    %c0_1 = arith.constant 0 : index
    %c0_2 = arith.constant 0 : index
    %0 = vector.load %arg1[%c0, %c0_0, %c0_1, %c0_2] : memref<1x16x4x256xf32, #tpu.memory_space<vmem>>, vector<1x16x4x256xf32>
    %1 = vector.shape_cast %0 : vector<1x16x4x256xf32> to vector<16x4x256xf32>
    %cst = arith.constant dense<0.000000e+00> : vector<16x256xf32>
    %2 = vector.multi_reduction <add>, %1, %cst [1] : vector<16x4x256xf32> to vector<16x256xf32>
    %cst_3 = arith.constant 4.000000e+00 : f32
    %3 = vector.broadcast %cst_3 : f32 to vector<16x256xf32>
    %4 = arith.divf %2, %3 : vector<16x256xf32>
    %c0_4 = arith.constant 0 : index
    %c0_5 = arith.constant 0 : index
    %c0_6 = arith.constant 0 : index
    %c0_7 = arith.constant 0 : index
    %5 = vector.load %arg2[%c0_4, %c0_5, %c0_6, %c0_7] : memref<1x8x8x256xf32, #tpu.memory_space<vmem>>, vector<1x8x8x256xf32>
    %6 = vector.shape_cast %5 : vector<1x8x8x256xf32> to vector<8x8x256xf32>
    %cst_8 = arith.constant dense<0.000000e+00> : vector<8x256xf32>
    %7 = vector.multi_reduction <add>, %6, %cst_8 [1] : vector<8x8x256xf32> to vector<8x256xf32>
    %cst_9 = arith.constant 8.000000e+00 : f32
    %8 = vector.broadcast %cst_9 : f32 to vector<8x256xf32>
    %9 = arith.divf %7, %8 : vector<8x256xf32>
    %10 = tpu.concatenate %4, %9 in 0 : vector<16x256xf32>, vector<8x256xf32> -> vector<24x256xf32>
    %11 = arith.truncf %10 : vector<24x256xf32> to vector<24x256xbf16>
    %c0_10 = arith.constant 0 : index
    %c0_11 = arith.constant 0 : index
    %c0_12 = arith.constant 0 : index
    %12 = vector.load %arg3[%c0_10, %c0_11, %c0_12] : memref<1x128x256xbf16, #tpu.memory_space<vmem>>, vector<1x128x256xbf16>
    %13 = vector.shape_cast %12 : vector<1x128x256xbf16> to vector<128x256xbf16>
    %cst_13 = arith.constant dense<0.000000e+00> : vector<128x24xf32>
    %14 = tpu.matmul %13, %11, %cst_13 {dimension_numbers = #tpu.dot_dimension_numbers<[1], [1], [0], [0], [0, 0, 1, 0], [], []>} : vector<128x256xbf16>, vector<24x256xbf16>, vector<128x24xf32> -> vector<128x24xf32>
    %15 = vector.extract_strided_slice %14 {offsets = [0, 0], sizes = [8, 24], strides = [1, 1]} : vector<128x24xf32> to vector<8x24xf32>
    %16 = vector.extract_strided_slice %14 {offsets = [8, 0], sizes = [8, 24], strides = [1, 1]} : vector<128x24xf32> to vector<8x24xf32>
    %17 = arith.maximumf %15, %16 : vector<8x24xf32>
    %18 = vector.extract_strided_slice %14 {offsets = [16, 0], sizes = [8, 24], strides = [1, 1]} : vector<128x24xf32> to vector<8x24xf32>
    %19 = arith.maximumf %17, %18 : vector<8x24xf32>
    %20 = vector.extract_strided_slice %14 {offsets = [24, 0], sizes = [8, 24], strides = [1, 1]} : vector<128x24xf32> to vector<8x24xf32>
    %21 = arith.maximumf %19, %20 : vector<8x24xf32>
    %22 = vector.extract_strided_slice %14 {offsets = [32, 0], sizes = [8, 24], strides = [1, 1]} : vector<128x24xf32> to vector<8x24xf32>
    %23 = arith.maximumf %21, %22 : vector<8x24xf32>
    %24 = vector.extract_strided_slice %14 {offsets = [40, 0], sizes = [8, 24], strides = [1, 1]} : vector<128x24xf32> to vector<8x24xf32>
    %25 = arith.maximumf %23, %24 : vector<8x24xf32>
    %26 = vector.extract_strided_slice %14 {offsets = [48, 0], sizes = [8, 24], strides = [1, 1]} : vector<128x24xf32> to vector<8x24xf32>
    %27 = arith.maximumf %25, %26 : vector<8x24xf32>
    %28 = vector.extract_strided_slice %14 {offsets = [56, 0], sizes = [8, 24], strides = [1, 1]} : vector<128x24xf32> to vector<8x24xf32>
    %29 = arith.maximumf %27, %28 : vector<8x24xf32>
    %30 = vector.extract_strided_slice %14 {offsets = [64, 0], sizes = [8, 24], strides = [1, 1]} : vector<128x24xf32> to vector<8x24xf32>
    %31 = arith.maximumf %29, %30 : vector<8x24xf32>
    %32 = vector.extract_strided_slice %14 {offsets = [72, 0], sizes = [8, 24], strides = [1, 1]} : vector<128x24xf32> to vector<8x24xf32>
    %33 = arith.maximumf %31, %32 : vector<8x24xf32>
    %34 = vector.extract_strided_slice %14 {offsets = [80, 0], sizes = [8, 24], strides = [1, 1]} : vector<128x24xf32> to vector<8x24xf32>
    %35 = arith.maximumf %33, %34 : vector<8x24xf32>
    %36 = vector.extract_strided_slice %14 {offsets = [88, 0], sizes = [8, 24], strides = [1, 1]} : vector<128x24xf32> to vector<8x24xf32>
    %37 = arith.maximumf %35, %36 : vector<8x24xf32>
    %38 = vector.extract_strided_slice %14 {offsets = [96, 0], sizes = [8, 24], strides = [1, 1]} : vector<128x24xf32> to vector<8x24xf32>
    %39 = arith.maximumf %37, %38 : vector<8x24xf32>
    %40 = vector.extract_strided_slice %14 {offsets = [104, 0], sizes = [8, 24], strides = [1, 1]} : vector<128x24xf32> to vector<8x24xf32>
    %41 = arith.maximumf %39, %40 : vector<8x24xf32>
    %42 = vector.extract_strided_slice %14 {offsets = [112, 0], sizes = [8, 24], strides = [1, 1]} : vector<128x24xf32> to vector<8x24xf32>
    %43 = arith.maximumf %41, %42 : vector<8x24xf32>
    %44 = vector.extract_strided_slice %14 {offsets = [120, 0], sizes = [8, 24], strides = [1, 1]} : vector<128x24xf32> to vector<8x24xf32>
    %45 = arith.maximumf %43, %44 : vector<8x24xf32>
    %c0_14 = arith.constant 0 : index
    %c0_15 = arith.constant 0 : index
    %c0_16 = arith.constant 0 : index
    %46 = vector.load %arg10[%c0_14, %c0_15, %c0_16] : memref<1x8x24xf32, #tpu.memory_space<vmem>>, vector<1x8x24xf32>
    %47 = vector.shape_cast %46 : vector<1x8x24xf32> to vector<8x24xf32>
    %48 = vector.shape_cast %45 : vector<8x24xf32> to vector<1x8x24xf32>
    tpu.vector_store %arg10[%c0_14, %c0_15, %c0_16], %48 {strides = array<i32>} : memref<1x8x24xf32, #tpu.memory_space<vmem>>, vector<1x8x24xf32>,
    %c0_17 = arith.constant 0 : index
    %c0_18 = arith.constant 0 : index
    %49 = vector.load %arg4[%c0_17, %c0_18] : memref<24x32xf32, #tpu.memory_space<vmem>>, vector<24x32xf32>
    %cst_19 = arith.constant dense<0.000000e+00> : vector<8x32xf32>
    %50 = tpu.matmul %45, %49, %cst_19 {dimension_numbers = #tpu.dot_dimension_numbers<[1], [0], [0], [1], [0, 0, 1, 1], [], []>} : vector<8x24xf32>, vector<24x32xf32>, vector<8x32xf32> -> vector<8x32xf32>
    %c0_20 = arith.constant 0 : index
    %c0_21 = arith.constant 0 : index
    %51 = vector.load %arg5[%c0_20, %c0_21] : memref<1x32xf32, #tpu.memory_space<vmem>>, vector<1x32xf32>
    %52 = vector.broadcast %51 : vector<1x32xf32> to vector<8x32xf32>
    %53 = arith.addf %50, %52 : vector<8x32xf32>
    %cst_22 = arith.constant 0.000000e+00 : f32
    %54 = vector.broadcast %cst_22 : f32 to vector<8x32xf32>
    %55 = arith.maximumf %53, %54 : vector<8x32xf32>
    %c0_23 = arith.constant 0 : index
    %c0_24 = arith.constant 0 : index
    %56 = vector.load %arg6[%c0_23, %c0_24] : memref<32x32xf32, #tpu.memory_space<vmem>>, vector<32x32xf32>
    %cst_25 = arith.constant dense<0.000000e+00> : vector<8x32xf32>
    %57 = tpu.matmul %55, %56, %cst_25 {dimension_numbers = #tpu.dot_dimension_numbers<[1], [0], [0], [1], [0, 0, 1, 1], [], []>} : vector<8x32xf32>, vector<32x32xf32>, vector<8x32xf32> -> vector<8x32xf32>
    %c0_26 = arith.constant 0 : index
    %c0_27 = arith.constant 0 : index
    %58 = vector.load %arg7[%c0_26, %c0_27] : memref<1x32xf32, #tpu.memory_space<vmem>>, vector<1x32xf32>
    %59 = vector.broadcast %58 : vector<1x32xf32> to vector<8x32xf32>
    %60 = arith.addf %57, %59 : vector<8x32xf32>
    %cst_28 = arith.constant 0.000000e+00 : f32
    %61 = vector.broadcast %cst_28 : f32 to vector<8x32xf32>
    %62 = arith.maximumf %60, %61 : vector<8x32xf32>
    %c0_29 = arith.constant 0 : index
    %c0_30 = arith.constant 0 : index
    %63 = vector.load %arg8[%c0_29, %c0_30] : memref<32x128xf32, #tpu.memory_space<vmem>>, vector<32x128xf32>
    %cst_31 = arith.constant dense<0.000000e+00> : vector<8x128xf32>
    %64 = tpu.matmul %62, %63, %cst_31 {dimension_numbers = #tpu.dot_dimension_numbers<[1], [0], [0], [1], [0, 0, 1, 1], [], []>} : vector<8x32xf32>, vector<32x128xf32>, vector<8x128xf32> -> vector<8x128xf32>
    %c0_32 = arith.constant 0 : index
    %c0_33 = arith.constant 0 : index
    %65 = vector.load %arg9[%c0_32, %c0_33] : memref<1x128xf32, #tpu.memory_space<vmem>>, vector<1x128xf32>
    %66 = vector.broadcast %65 : vector<1x128xf32> to vector<8x128xf32>
    %67 = arith.addf %64, %66 : vector<8x128xf32>
    %c0_34 = arith.constant 0 : index
    %c0_35 = arith.constant 0 : index
    %c0_36 = arith.constant 0 : index
    %68 = vector.load %arg11[%c0_34, %c0_35, %c0_36] : memref<1x8x128xf32, #tpu.memory_space<vmem>>, vector<1x8x128xf32>
    %69 = vector.shape_cast %68 : vector<1x8x128xf32> to vector<8x128xf32>
    %70 = vector.shape_cast %67 : vector<8x128xf32> to vector<1x8x128xf32>
    tpu.vector_store %arg11[%c0_34, %c0_35, %c0_36], %70 {strides = array<i32>} : memref<1x8x128xf32, #tpu.memory_space<vmem>>, vector<1x8x128xf32>,
    %71 = arith.negf %67 : vector<8x128xf32>
    %72 = math.exp %71 : vector<8x128xf32>
    %cst_37 = arith.constant 1.000000e+00 : f32
    %73 = vector.broadcast %cst_37 : f32 to vector<8x128xf32>
    %74 = arith.addf %73, %72 : vector<8x128xf32>
    %75 = arith.divf %73, %74 : vector<8x128xf32>
    %c0_38 = arith.constant 0 : index
    %c0_39 = arith.constant 0 : index
    %c0_40 = arith.constant 0 : index
    %76 = vector.load %arg12[%c0_38, %c0_39, %c0_40] : memref<1x8x128xf32, #tpu.memory_space<vmem>>, vector<1x8x128xf32>
    %77 = vector.shape_cast %76 : vector<1x8x128xf32> to vector<8x128xf32>
    %78 = vector.shape_cast %75 : vector<8x128xf32> to vector<1x8x128xf32>
    tpu.vector_store %arg12[%c0_38, %c0_39, %c0_40], %78 {strides = array<i32>} : memref<1x8x128xf32, #tpu.memory_space<vmem>>, vector<1x8x128xf32>,
    return
  }
  func.func @transform_0(%arg0: i32) -> (i32, i32, i32, i32) {
    %c0_i32 = arith.constant 0 : i32
    %c0_i32_0 = arith.constant 0 : i32
    %c0_i32_1 = arith.constant 0 : i32
    %c0_i32_2 = arith.constant 0 : i32
    return %arg0, %c0_i32, %c0_i32_0, %c0_i32_1 : i32, i32, i32, i32
  }
  func.func @transform_1(%arg0: i32) -> (i32, i32, i32, i32) {
    %c0_i32 = arith.constant 0 : i32
    %c0_i32_0 = arith.constant 0 : i32
    %c0_i32_1 = arith.constant 0 : i32
    %c0_i32_2 = arith.constant 0 : i32
    return %arg0, %c0_i32, %c0_i32_0, %c0_i32_1 : i32, i32, i32, i32
  }
  func.func @transform_2(%arg0: i32) -> (i32, i32, i32) {
    %c0_i32 = arith.constant 0 : i32
    %c0_i32_0 = arith.constant 0 : i32
    %c0_i32_1 = arith.constant 0 : i32
    return %arg0, %c0_i32, %c0_i32_0 : i32, i32, i32
  }
  func.func @transform_3(%arg0: i32) -> (i32, i32) {
    %c0_i32 = arith.constant 0 : i32
    %c0_i32_0 = arith.constant 0 : i32
    %c0_i32_1 = arith.constant 0 : i32
    return %c0_i32, %c0_i32_0 : i32, i32
  }
  func.func @transform_4(%arg0: i32) -> (i32, i32) {
    %c0_i32 = arith.constant 0 : i32
    %c0_i32_0 = arith.constant 0 : i32
    %c0_i32_1 = arith.constant 0 : i32
    return %c0_i32, %c0_i32_0 : i32, i32
  }
  func.func @transform_5(%arg0: i32) -> (i32, i32) {
    %c0_i32 = arith.constant 0 : i32
    %c0_i32_0 = arith.constant 0 : i32
    %c0_i32_1 = arith.constant 0 : i32
    return %c0_i32, %c0_i32_0 : i32, i32
  }
  func.func @transform_6(%arg0: i32) -> (i32, i32) {
    %c0_i32 = arith.constant 0 : i32
    %c0_i32_0 = arith.constant 0 : i32
    %c0_i32_1 = arith.constant 0 : i32
    return %c0_i32, %c0_i32_0 : i32, i32
  }
  func.func @transform_7(%arg0: i32) -> (i32, i32) {
    %c0_i32 = arith.constant 0 : i32
    %c0_i32_0 = arith.constant 0 : i32
    %c0_i32_1 = arith.constant 0 : i32
    return %c0_i32, %c0_i32_0 : i32, i32
  }
  func.func @transform_8(%arg0: i32) -> (i32, i32) {
    %c0_i32 = arith.constant 0 : i32
    %c0_i32_0 = arith.constant 0 : i32
    %c0_i32_1 = arith.constant 0 : i32
    return %c0_i32, %c0_i32_0 : i32, i32
  }
  func.func @transform_9(%arg0: i32) -> (i32, i32, i32) {
    %c0_i32 = arith.constant 0 : i32
    %c0_i32_0 = arith.constant 0 : i32
    %c0_i32_1 = arith.constant 0 : i32
    return %arg0, %c0_i32, %c0_i32_0 : i32, i32, i32
  }
  func.func @transform_10(%arg0: i32) -> (i32, i32, i32) {
    %c0_i32 = arith.constant 0 : i32
    %c0_i32_0 = arith.constant 0 : i32
    %c0_i32_1 = arith.constant 0 : i32
    return %arg0, %c0_i32, %c0_i32_0 : i32, i32, i32
  }
  func.func @transform_11(%arg0: i32) -> (i32, i32, i32) {
    %c0_i32 = arith.constant 0 : i32
    %c0_i32_0 = arith.constant 0 : i32
    %c0_i32_1 = arith.constant 0 : i32
    return %arg0, %c0_i32, %c0_i32_0 : i32, i32, i32
  }
}

</mosaic_0001>

<bundles_post_ra>
// kernel: tpu_custom_call.1
= control target key start
LH: loop header
LB: loop body
LE: loop exit
PB: predicated region body
PF: predicated region fallthrough
CT: control target
= control target key end

     0   :  { %s3186_s0 = inlined_call_operand.hbm [shape: f32[2,16,4,256], index: 0, kind: input, shape index: {}]   ;;  %s3187_s1 = inlined_call_operand.hbm [shape: f32[2,8,8,256], index: 1, kind: input, shape index: {}]   ;;  %s3188_s2 = inlined_call_operand.hbm [shape: bf16[2,128,256], index: 2, kind: input, shape index: {}]   ;;  %s3189_s3 = inlined_call_operand.hbm [shape: f32[24,32], index: 3, kind: input, shape index: {}]   ;;  %s3190_s4 = inlined_call_operand.vmem [shape: f32[1,32], index: 4, kind: input, shape index: {}]   ;;  %s3191_s5 = inlined_call_operand.hbm [shape: f32[32,32], index: 5, kind: input, shape index: {}]   ;;  %s3192_s6 = inlined_call_operand.vmem [shape: f32[1,32], index: 6, kind: input, shape index: {}]   ;;  %s3193_s7 = inlined_call_operand.hbm [shape: f32[32,128], index: 7, kind: input, shape index: {}]   ;;  %s3194_s8 = inlined_call_operand.vmem [shape: f32[1,128], index: 8, kind: input, shape index: {}]   ;;  %s3195_s9 = inlined_call_operand.hbm [shape: f32[2,8,24], index: 9, kind: output, shape index: {0}]   ;;  %s3196_s10 = inlined_call_operand.hbm [shape: f32[2,8,128], index: 10, kind: output, shape index: {1}]   ;;  %s3197_s11 = inlined_call_operand.hbm [shape: f32[2,8,128], index: 11, kind: output, shape index: {2}]  }
   0x1   :  { %3227 = sst [smem:[#allocation29_spill]] %s3187_s1 }
   0x2   :  { %3228 = sst [smem:[#allocation30_spill]] %s3189_s3 }
   0x3   :  { %3229 = sst [smem:[#allocation31_spill]] %s3190_s4 }
   0x4   :  { %3230 = sst [smem:[#allocation32_spill]] %s3192_s6 }
   0x5   :  { %3231 = sst [smem:[#allocation33_spill]] %s3194_s8 }
   0x6   :  { %3232 = sst [smem:[#allocation34_spill]] %s3195_s9 }
   0x7   :  { %3233 = sst [smem:[#allocation35_spill]] %s3196_s10 }
   0x8   :  { %3234 = sst [smem:[#allocation36_spill]] %s3197_s11 }
   0x9   :  { %17 = vsyncpa [#allocation3], 0 }
   0xa   :  { %19 = vsyncpa [#allocation3 + $0x1], 0 }
   0xb   :  { %20 = vsyncpa [#allocation6], 0 }
   0xc   :  { %22 = vsyncpa [#allocation6 + $0x1], 0 }
   0xd   :  { %23 = vsyncpa [#allocation9], 0 }
   0xe   :  { %24 = vsyncpa [#allocation12], 0 }
   0xf   :  { %25 = vsyncpa [#allocation4], 0 }
  0x10   :  { %27 = vsyncpa [#allocation4 + $0x1], 0 }
  0x11   :  { %28 = vsyncpa [#allocation15], 0 }
  0x12   :  { %30 = vsyncpa [#allocation15 + $0x1], 0  ;;  %s2489_s17 = smov 0   ;;  %s2491_s18 = smov 0  }
  0x13   :  { %s2493_s19 = smov 0   ;;  %s2495_s20 = smov 0  }
  0x14 LB: > { %3235 = sst [smem:[#allocation23_spill]] %s2399_s17  ;;  %s2510_s21 = sadd.s32 4294967295, %s2411_s20   ;;  %s2411_s20 = sphi %s2495_s20, %s3281_s20   ;;  %s2407_s19 = sphi %s2493_s19, %s3285_s19   ;;  %s2403_s18 = sphi %s2491_s18, %s3284_s18   ;;  %s2399_s17 = sphi %s2489_s17, %s3283_s17  }
  0x15   : > { %3236 = sst [smem:[#allocation24_spill]] %s2411_s20  ;;  %s3198_s22 = sadd.s32 4294967294, %s2411_s20  }
  0x16   : > { %s2514_s23 = sadd.s32 1, %s2411_s20   ;;  %s43_s24 = sadd.s32 1, %s2407_s19 }
  0x17   : > { %3237 = sst [smem:[#allocation25_spill]] %s2514_s23  ;;  %s40_s25 = ssub.s32 %s2411_s20, %s2514_s23 }
  0x18   : > { %p50_p0 = scmp.ne.s32.totalorder %s2407_s19, %s2403_s18  ;;  %p41_p1 = scmp.eq.s32.totalorder %s40_s25, 0 }
  0x19   : > { %p51_p2 = scmp.eq.s32.totalorder %s2411_s20, 0  ;;  %p56_p3 = scmp.ne.s32.totalorder %s2403_s18, %s2399_s17 }
  0x1a   : > { %p3204_p4 = scmp.eq.s32.totalorder %s2510_s21, 0  ;;  %p258_p7 = scmp.eq.s32.totalorder %s2510_s21, 1 }
  0x1b   : > { %s2526_s26 = scalar_select %p41_p1, %s2407_s19, %s43_s24  }
  0x1c   : > { %p2528_p5 = por %p51_p2, %p50_p0  ;;  %p2534_p6 = por %p3204_p4, %p56_p3 }
  0x1d   : > { %3238 = sst [smem:[#allocation26_spill]] %s2526_s26  ;;  %p264_p8 = scmp.eq.s32.totalorder %s3198_s22, 1 }
  0x1e   : > { %s3239_s27 = scalar_select %p2528_p5, 1, 0 }
  0x1f   : > { %s3240_s28 = scalar_select %p2534_p6, 1, 0 }
  0x20   : > { %p1829_p9 = scmp.ge.s32.totalorder %s2411_s20, 1  ;;  %p323_p10 = scmp.lt.s32.totalorder %s2411_s20, 3 }
  0x21   : > { %p2543_p11 = por %p258_p7, %p50_p0  ;;  %p2547_p12 = por %p264_p8, %p56_p3 }
  0x22   : > { %p2551_p13 = pnand %p1829_p9, %p323_p10  ;;  %s2413_s13 = smov [#allocation8]  }
  0x23   : > { %s3241_s29 = scalar_select %p2543_p11, 1, 0 }
  0x24   : > { %s3243_s30 = scalar_select %p2547_p12, 1, 0 }
  0x25   : > { %3242 = sst [smem:[#allocation27_spill]] %s3241_s29  ;;  %p1975_p1 = pneg %p2551_p13 }
  0x26   : > { %3244 = sst [smem:[#allocation28_spill]] %s3243_s30  ;;  %s335_s14 = sshll.u32 %s2413_s13, 4  ;;  %s336_s14 = int_to_ptr.vmem [resolvable:$true] %s335_s14 }
  0x27   : > { %s3245_s12 = scalar_select %p2551_p13, 1, 0 }
  0x28   : > { %p2559_p2 = pnand %p1975_p1, %p3204_p4  ;;  %s3203_s16 = sand.u32 1, %s2407_s19  }
  0x29   : > { %s2568_s24 = sshll.u32 %s3203_s16, 7  ;;  %s3247_s3 = sld [smem:[#allocation30_spill]] }
  0x2a   : > { %s3246_s15 = scalar_select %p2559_p2, 1, 0 }
  0x2b   : > { %p2578_p8 = pneg %p2559_p2 }
  0x2d   : > { %s3248_s13 = scalar_select %p2578_p8, 1, 0 }
  0x2f   : > { %s2099_s26 = scalar_lea.hbm %s3247_s3, 384 }
  0x30   : > { %p2100_p7 = scmp.ne.s32.totalorder %s3247_s3, %s2099_s26  ;;  %p2106_p1 = scmp.lt.u32.totalorder %s2099_s26, %s3247_s3 }
  0x32   : > { %p2102_p9 = pnand %p2578_p8, %p2100_p7 }
  0x34   : > { %p2103_p10 = pneg %p2102_p9 }
  0x36   : > { %p2108_p0 = pnand %p2106_p1, %p2103_p10 }
  0x38   : > { %2111 = shalt.err (!%p2108_p0)
}
  0x39   : > { %s2112_s22 = scalar_lea.vmem %s336_s14, 384  ;;  %p2120_p11 = scmp.lt.s32.totalorder %s336_s14, %s336_s14 }
  0x3a   : > { %p2113_p4 = scmp.ne.s32.totalorder %s336_s14, %s2112_s22  ;;  %p2121_p6 = scmp.lt.s32.totalorder %s2112_s22, %s2112_s22 }
  0x3c   : > { %p2115_p3 = pnand %p2113_p4, %p2578_p8  ;;  %p2122_p13 = por %p2121_p6, %p2120_p11 }
  0x3e   : > { %p2116_p12 = pneg %p2115_p3 }
  0x40   : > { %p2123_p5 = pnand %p2122_p13, %p2116_p12 }
  0x42   : > { %2126 = shalt.err (!%p2123_p5)
}
  0x43   : > { %s3210_s23 = smov 128   ;;  %s3212_s17 = smov 8  }
  0x44   : > { %1978 = dma.hbm_to_vmem [thread:$0]  (!%p2559_p2), %s3247_s3, 384, %s336_s14, [#allocation9], %s3210_s23, %s3210_s23, %s3212_s17  }
  0x45   : > { %s2598_s16 = sshll.u32 %s2411_s20, 11  ;;  %p3249_p4 = scmp.ne.s32.totalorder %s3239_s27, 0 }
  0x46   : > { %p3250_p5 = scmp.lt.s32.totalorder %s2411_s20, 2  ;;  %s405_s22 = sand.u32 1, %s2411_s20  }
  0x47   : > { %s3252_s1 = sld [smem:[#allocation29_spill]]  ;;  %s409_s14 = scalar_lea.vmem [#allocation5], %s2568_s24 }
  0x48   : > { %p2604_p6 = pnand %p3250_p5, %p3249_p4  ;;  %s416_s26 = sshll.u32 %s409_s14, 4  ;;  %s2616_s26 = int_to_ptr.vmem [resolvable:$true] %s416_s26 }
  0x49   : > { %s2618_s27 = scalar_lea.sflag [#allocation6], %s405_s22 }
  0x4a   : > { %s3251_s25 = scalar_select %p2604_p6, 1, 0 }
  0x4b   : > { %p2624_p12 = pneg %p2604_p6 }
  0x4d   : > { %s2613_s8 = scalar_lea.hbm %s3252_s1, %s2598_s16  ;;  %s2132_s17 = scalar_lea.hbm %s3252_s1, 4096 }
  0x4e   : > { %s2127_s30 = scalar_lea.hbm %s2613_s8, 2048  ;;  %p2133_p3 = scmp.lt.u32.totalorder %s2613_s8, %s3252_s1 }
  0x4f   : > { %p2128_p11 = scmp.ne.s32.totalorder %s2613_s8, %s2127_s30  ;;  %p2134_p7 = scmp.lt.u32.totalorder %s2132_s17, %s2127_s30 }
  0x50   : > { %s3253_s23 = scalar_select %p2624_p12, 1, 0 }
  0x51   : > { %p2130_p13 = pnand %p2624_p12, %p2128_p11  ;;  %p2135_p9 = por %p2134_p7, %p2133_p3 }
  0x52   : > { %p2136_p10 = scmp.lt.u32.totalorder %s2127_s30, %s2613_s8 }
  0x53   : > { %p2131_p0 = pneg %p2130_p13 }
  0x54   : > { %p2137_p1 = por %p2136_p10, %p2135_p9 }
  0x56   : > { %p2138_p4 = pnand %p2137_p1, %p2131_p0 }
  0x58   : > { %2141 = shalt.err (!%p2138_p4)
}
  0x59   : > { %s2142_s22 = scalar_lea.vmem %s2616_s26, 2048  ;;  %s2416_s10 = smov [#allocation5]  }
  0x5a   : > { %p2143_p5 = scmp.ne.s32.totalorder %s2616_s26, %s2142_s22  ;;  %s2147_s11 = sshll.u32 %s2416_s10, 4  ;;  %s2148_s11 = int_to_ptr.vmem [resolvable:$false] %s2147_s11 }
  0x5b   : > { %s2149_s3 = scalar_lea.vmem %s2148_s11, 4096  ;;  %p2150_p2 = scmp.lt.s32.totalorder %s2616_s26, %s2148_s11 }
  0x5c   : > { %p2145_p11 = pnand %p2143_p5, %p2624_p12  ;;  %p2151_p8 = scmp.lt.s32.totalorder %s2149_s3, %s2142_s22 }
  0x5e   : > { %p2146_p13 = pneg %p2145_p11  ;;  %p2152_p3 = por %p2151_p8, %p2150_p2 }
  0x60   : > { %p2153_p7 = pnand %p2152_p3, %p2146_p13 }
  0x62   : > { %2156 = shalt.err (!%p2153_p7)
}
  0x63   : > { %s2417_s17 = smov 256   ;;  %s2418_s30 = smov 16  }
  0x64   : > { %1991 = dma.hbm_to_vmem [thread:$0]  (!%p2604_p6), %s2613_s8, 2048, %s2616_s26, %s2618_s27, %s2417_s17, %s2417_s17, %s2418_s30  }
  0x65   : > { %s2419_s14 = smov [#allocation10]   ;;  %s2420_s10 = smov [#allocation11]  }
  0x66   : > { %s351_s1 = sshll.u32 %s2419_s14, 4  ;;  %s367_s20 = sshll.u32 %s2420_s10, 4  ;;  %s352_s1 = int_to_ptr.vmem [resolvable:$true] %s351_s1  ;;  %s368_s20 = int_to_ptr.vmem [resolvable:$true] %s367_s20 }
  0x67   : > { %s2157_s22 = scalar_lea.hbm %s3191_s5, 512  ;;  %p3254_p8 = scmp.ne.s32.totalorder %s3248_s13, 0 }
  0x68   : > { %p2158_p2 = scmp.ne.s32.totalorder %s3191_s5, %s2157_s22  ;;  %p2164_p10 = scmp.lt.u32.totalorder %s2157_s22, %s3191_s5 }
  0x6a   : > { %p2160_p0 = pnand %p2158_p2, %p3254_p8 }
  0x6c   : > { %p2161_p9 = pneg %p2160_p0 }
  0x6e   : > { %p2166_p1 = pnand %p2164_p10, %p2161_p9 }
  0x70   : > { %2169 = shalt.err (!%p2166_p1)
}
  0x71   : > { %s2170_s8 = scalar_lea.vmem %s352_s1, 512  ;;  %p2178_p13 = scmp.lt.s32.totalorder %s352_s1, %s352_s1 }
  0x72   : > { %p2171_p4 = scmp.ne.s32.totalorder %s352_s1, %s2170_s8  ;;  %p2179_p3 = scmp.lt.s32.totalorder %s2170_s8, %s2170_s8 }
  0x74   : > { %p2173_p5 = pnand %p2171_p4, %p3254_p8  ;;  %p2180_p7 = por %p2179_p3, %p2178_p13 }
  0x76   : > { %p2174_p11 = pneg %p2173_p5 }
  0x78   : > { %p2181_p6 = pnand %p2180_p7, %p2174_p11 }
  0x7a   : > { %2184 = shalt.err (!%p2181_p6)
}
  0x7b   : > { %p3255_p2 = scmp.ne.s32.totalorder %s3246_s15, 0  ;;  %s3256_s6 = smov 8  }
  0x7c   : > { %s3257_s9 = smov 128   ;;  %s2185_s30 = scalar_lea.hbm %s3193_s7, 512 }
  0x7d   : > { %1981 = dma.hbm_to_vmem [thread:$0]  (!%p3255_p2), %s3191_s5, 512, %s352_s1, [#allocation9], %s3257_s9, %s3257_s9, %s3256_s6  }
  0x7e   : > { %p2186_p0 = scmp.ne.s32.totalorder %s3193_s7, %s2185_s30  ;;  %p2192_p10 = scmp.lt.u32.totalorder %s2185_s30, %s3193_s7 }
  0x80   : > { %p2188_p6 = pnand %p2186_p0, %p3254_p8 }
  0x82   : > { %p2189_p9 = pneg %p2188_p6 }
  0x84   : > { %p2194_p1 = pnand %p2192_p10, %p2189_p9 }
  0x86   : > { %2197 = shalt.err (!%p2194_p1)
}
  0x87   : > { %s2198_s3 = scalar_lea.vmem %s368_s20, 512  ;;  %p2206_p13 = scmp.lt.s32.totalorder %s368_s20, %s368_s20 }
  0x88   : > { %p2199_p4 = scmp.ne.s32.totalorder %s368_s20, %s2198_s3  ;;  %p2207_p3 = scmp.lt.s32.totalorder %s2198_s3, %s2198_s3 }
  0x8a   : > { %p2201_p5 = pnand %p2199_p4, %p3254_p8  ;;  %p2208_p7 = por %p2207_p3, %p2206_p13 }
  0x8c   : > { %p2202_p11 = pneg %p2201_p5 }
  0x8e   : > { %p2209_p12 = pnand %p2208_p7, %p2202_p11 }
  0x90   : > { %2212 = shalt.err (!%p2209_p12)
}
  0x91   : > { %1984 = dma.hbm_to_vmem [thread:$0]  (!%p3255_p2), %s3193_s7, 512, %s368_s20, [#allocation12], %s3257_s9, %s3257_s9, %s3256_s6  }
  0x92   : > { %s2694_s29 = scalar_lea.hbm %s3186_s0, %s2598_s16  ;;  %s388_s15 = scalar_lea.vmem [#allocation2], %s2568_s24 }
  0x93   : > { %s395_s26 = sshll.u32 %s388_s15, 4  ;;  %s2703_s14 = scalar_lea.hbm %s3188_s2, %s2598_s16  ;;  %s2697_s26 = int_to_ptr.vmem [resolvable:$true] %s395_s26 }
  0x94   : > { %s3258_s10 = sand.u32 1, %s2407_s19   ;;  %s2213_s11 = scalar_lea.hbm %s2694_s29, 2048 }
  0x95   : > { %s2707_s20 = scalar_lea.sflag [#allocation3], %s3258_s10  ;;  %p2214_p12 = scmp.ne.s32.totalorder %s2694_s29, %s2213_s11 }
  0x96   : > { %p3259_p8 = scmp.ne.s32.totalorder %s3253_s23, 0  ;;  %s2218_s1 = scalar_lea.hbm %s3186_s0, 4096 }
  0x97   : > { %p2219_p6 = scmp.lt.u32.totalorder %s2694_s29, %s3186_s0  ;;  %p2220_p9 = scmp.lt.u32.totalorder %s2218_s1, %s2213_s11 }
  0x98   : > { %p2216_p2 = pnand %p2214_p12, %p3259_p8  ;;  %p2222_p1 = scmp.lt.u32.totalorder %s2213_s11, %s2694_s29 }
  0x99   : > { %p2221_p10 = por %p2220_p9, %p2219_p6 }
  0x9a   : > { %p2217_p0 = pneg %p2216_p2 }
  0x9b   : > { %p2223_p4 = por %p2222_p1, %p2221_p10 }
  0x9d   : > { %p2224_p5 = pnand %p2223_p4, %p2217_p0 }
  0x9f   : > { %2227 = shalt.err (!%p2224_p5)
}
  0xa0   : > { %s2228_s16 = scalar_lea.vmem %s2697_s26, 2048  ;;  %s2421_s4 = smov [#allocation2]  }
  0xa1   : > { %p2229_p11 = scmp.ne.s32.totalorder %s2697_s26, %s2228_s16  ;;  %s2233_s15 = sshll.u32 %s2421_s4, 4  ;;  %s2234_s15 = int_to_ptr.vmem [resolvable:$false] %s2233_s15 }
  0xa2   : > { %s2235_s17 = scalar_lea.vmem %s2234_s15, 4096  ;;  %p2236_p7 = scmp.lt.s32.totalorder %s2697_s26, %s2234_s15 }
  0xa3   : > { %p2231_p13 = pnand %p2229_p11, %p3259_p8  ;;  %p2237_p12 = scmp.lt.s32.totalorder %s2235_s17, %s2228_s16 }
  0xa5   : > { %p2232_p3 = pneg %p2231_p13  ;;  %p2238_p2 = por %p2237_p12, %p2236_p7 }
  0xa7   : > { %p2239_p6 = pnand %p2238_p2, %p2232_p3 }
  0xa9   : > { %2242 = shalt.err (!%p2239_p6)
}
  0xaa   : > { %p3260_p0 = scmp.ne.s32.totalorder %s3251_s25, 0  ;;  %s430_s30 = scalar_lea.vmem [#allocation7], %s2568_s24 }
  0xab   : > { %s437_s10 = sshll.u32 %s430_s30, 4  ;;  %s2243_s11 = scalar_lea.hbm %s2703_s14, 2048  ;;  %s2735_s10 = int_to_ptr.vmem [resolvable:$true] %s437_s10 }
  0xac   : > { %1988 = dma.hbm_to_vmem [thread:$0]  (!%p3260_p0), %s2694_s29, 2048, %s2697_s26, %s2707_s20, %s3257_s9, %s3257_s9, %s3256_s6  }
  0xad   : > { %p2244_p9 = scmp.ne.s32.totalorder %s2703_s14, %s2243_s11  ;;  %s2248_s1 = scalar_lea.hbm %s3188_s2, 4096 }
  0xae   : > { %p2249_p4 = scmp.lt.u32.totalorder %s2703_s14, %s3188_s2  ;;  %p2250_p5 = scmp.lt.u32.totalorder %s2248_s1, %s2243_s11 }
  0xaf   : > { %p2246_p10 = pnand %p2244_p9, %p3259_p8  ;;  %p2252_p13 = scmp.lt.u32.totalorder %s2243_s11, %s2703_s14 }
  0xb0   : > { %p2251_p11 = por %p2250_p5, %p2249_p4 }
  0xb1   : > { %p2247_p1 = pneg %p2246_p10 }
  0xb2   : > { %p2253_p3 = por %p2252_p13, %p2251_p11 }
  0xb4   : > { %p2254_p7 = pnand %p2253_p3, %p2247_p1 }
  0xb6   : > { %2257 = shalt.err (!%p2254_p7)
}
  0xb7   : > { %s2258_s24 = scalar_lea.vmem %s2735_s10, 2048  ;;  %s2422_s29 = smov [#allocation7]  }
  0xb8   : > { %p2259_p12 = scmp.ne.s32.totalorder %s2735_s10, %s2258_s24  ;;  %s2263_s26 = sshll.u32 %s2422_s29, 4  ;;  %s2264_s26 = int_to_ptr.vmem [resolvable:$false] %s2263_s26 }
  0xb9   : > { %s2265_s20 = scalar_lea.vmem %s2264_s26, 4096  ;;  %p2266_p9 = scmp.lt.s32.totalorder %s2735_s10, %s2264_s26 }
  0xba   : > { %p2261_p2 = pnand %p2259_p12, %p3259_p8  ;;  %p2267_p10 = scmp.lt.s32.totalorder %s2265_s20, %s2258_s24 }
  0xbc   : > { %p2262_p6 = pneg %p2261_p2  ;;  %p2268_p4 = por %p2267_p10, %p2266_p9 }
  0xbe   : > { %p2269_p5 = pnand %p2268_p4, %p2262_p6 }
  0xc0   : > { %2272 = shalt.err (!%p2269_p5)
}
  0xc1   : > { %1994 = dma.hbm_to_vmem [thread:$0]  (!%p3260_p0), %s2703_s14, 2048, %s2735_s10, %s2618_s27, %s3257_s9, %s3257_s9, %s3256_s6  }
  0xc2   : > { %p3261_p8 = scmp.ne.s32.totalorder %s3245_s12, 0 }
  0xc3   : > { %s2765_s23 = sand.u32 (!%p3261_p8), 1, %s2403_s18   ;;  %p3262_p1 = scmp.ne.s32.totalorder (!%p3261_p8), %s3240_s28, 0 }
  0xc4   : > { %449 = sbr.rel (%p3261_p8) target bundleno = 1298 (0x512), region = 56  ;;  %s1844_s16 = sshll.u32 (!%p3261_p8), %s2765_s23, 7 }
  0xc5   : > { %s452_s4 = scalar_lea.sflag (!%p3261_p8), [#allocation3], %s2765_s23  ;;  %s2769_s15 = scalar_lea.vmem (!%p3261_p8), [#allocation2], %s1844_s16 }
  0xcb   : > { %2374 = dma.done.wait (%p3262_p1), %s452_s4, 2048  }
  0xcc   : > { %2376 = vsyncadd (%p3262_p1), %s452_s4, 4294965248  ;;  %s460_s12 = sand.u32 1, %s2510_s21   ;;  %s2778_s27 = scalar_lea.vmem [#allocation5], %s1844_s16 }
  0xcd   : > { %s461_s25 = scalar_lea.sflag [#allocation6], %s460_s12 }
  0xce   : > { %2378 = dma.done.wait (%p3262_p1), %s461_s25, 4096  }
  0xcf   : > { %2380 = vsyncadd (%p3262_p1), %s461_s25, 4294963200  ;;  %s2784_s6 = scalar_lea.vmem [#allocation7], %s1844_s16  ;;  %p3263_p0 = scmp.eq.s32.totalorder %s2510_s21, 0 }
  0xd1   : > { %2382 = dma.done.wait (%p3263_p0), [#allocation9], 896   ;;  %p3264_p11 = pmov %p3263_p0 }
  0xd2   : > { %p3265_p13 = pmov %p3263_p0 }
  0xd3   : > { %2384 = vsyncadd (%p3264_p11), [#allocation9], 4294966400 }
  0xd4   : > { %2386 = dma.done.wait (%p3265_p13), [#allocation12], 512   ;;  %p3266_p3 = pmov %p3263_p0 }
  0xd5   : > { %vm609_vm0 = vcmask 1043456   ;;  %v545_v0 = vld [vmem:[%s2769_s15] sm:$0xff]  ;;  %v2796_v1 = vld [vmem:[%s2769_s15 + $0x8] sm:$0xff]  ;;  %v2799_v2 = vld [vmem:[%s2769_s15 + $0x10] sm:$0xff]  ;;  %vm1028_vm1 = vcmask 1041409   ;;  %vm1030_vm2 = vcmask 1042434  }
  0xd6   : > { %2388 = vsyncadd (%p3266_p3), [#allocation12], 4294966784  ;;  %v2802_v3 = vld [vmem:[%s2769_s15 + $0x18] sm:$0xff]  ;;  %v2805_v4 = vld [vmem:[%s2769_s15 + $0x20] sm:$0xff]  ;;  %v577_v6 = vcombine.high %v545_v0, %v545_v0  ;;  %v578_v7 = vcombine.high %v2796_v1, %v2796_v1  ;;  %v579_v8 = vcombine.high %v2799_v2, %v2799_v2  ;;  %v2815_v9 = vsel %vm609_vm0, %v545_v0, 0.0  ;;  %s3048_s28 = sshll.u32 %s2765_s23, 3 }
  0xd7   : > { %v2808_v5 = vld [vmem:[%s2769_s15 + $0x28] sm:$0xff]  ;;  %v2818_v10 = vld [vmem:[%s2769_s15 + $0x30] sm:$0xff]  ;;  %v2821_v11 = vld [vmem:[%s2769_s15 + $0x38] sm:$0xff]  ;;  %v580_v13 = vcombine.high %v2802_v3, %v2802_v3  ;;  %v581_v14 = vcombine.high %v2805_v4, %v2805_v4  ;;  %v611_v16 = vrot.slane %v2815_v9, 4  ;;  %vm1032_vm3 = vcmask 1043459   ;;  %s529_s9 = scalar_lea.vmem [#allocation13], %s3048_s28 }
  0xd8   : > { %v2824_v12 = vld [vmem:[%s2769_s15 + $0x40] sm:$0xff]  ;;  %v582_v15 = vcombine.high %v2808_v5, %v2808_v5  ;;  %v2834_v17 = vld [vmem:[%s2769_s15 + $0x48] sm:$0xff]  ;;  %v2837_v18 = vld [vmem:[%s2769_s15 + $0x50] sm:$0xff]  ;;  %v583_v20 = vcombine.high %v2818_v10, %v2818_v10  ;;  %v584_v21 = vcombine.high %v2821_v11, %v2821_v11  ;;  %v617_v23 = vsel %vm609_vm0, %v577_v6, 0.0  ;;  %s3267_s30 = sld [smem:[#allocation31_spill]]  ;;  %s3268_s10 = sld [smem:[#allocation27_spill]] }
  0xd9   : > { %v2840_v19 = vld [vmem:[%s2769_s15 + $0x58] sm:$0xff]  ;;  %v585_v22 = vcombine.high %v2824_v12, %v2824_v12  ;;  %v2850_v24 = vld [vmem:[%s2769_s15 + $0x60] sm:$0xff]  ;;  %v2853_v25 = vld [vmem:[%s2769_s15 + $0x68] sm:$0xff]  ;;  %v586_v27 = vcombine.high %v2834_v17, %v2834_v17  ;;  %v587_v28 = vcombine.high %v2837_v18, %v2837_v18  ;;  %v618_v30 = vrot.slane %v617_v23, 4  ;;  %s3269_s3 = sld [smem:[#allocation32_spill]]  ;;  %s3069_s1 = sshll.u32 %s2510_s21, 7 }
  0xda   : > { %v2856_v26 = vld [vmem:[%s2769_s15 + $0x70] sm:$0xff]  ;;  %v588_v29 = vcombine.high %v2840_v19, %v2840_v19  ;;  %v2865_v31 = vld [vmem:[%s2769_s15 + $0x78] sm:$0xff]  ;;  %v589_v32 = vcombine.high %v2850_v24, %v2850_v24  ;;  %v590_v33 = vcombine.high %v2853_v25, %v2853_v25  ;;  %v631_v35 = vsel %vm609_vm0, %v578_v7, 0.0  ;;  %s3270_s24 = sld [smem:[#allocation34_spill]]  ;;  %s1599_s26 = sshll.u32 %s529_s9, 4  ;;  %s1600_s26 = int_to_ptr.vmem [resolvable:$true] %s1599_s26 }
  0xdb   : > { %v591_v34 = vcombine.high %v2856_v26, %v2856_v26  ;;  %v592_v36 = vcombine.high %v2865_v31, %v2865_v31  ;;  %v619_v37 = vadd.f32 %v618_v30, %v617_v23  ;;  %v632_v38 = vrot.slane %v631_v35, 4  ;;  %s1576_s20 = scalar_lea.sflag [#allocation4], %s2765_s23  ;;  %s2273_s16 = scalar_lea.vmem %s1600_s26, 128 }
  0xdc   : > { %v645_v39 = vsel %vm609_vm0, %v579_v8, 0.0  ;;  %v659_v41 = vsel %vm609_vm0, %v580_v13, 0.0  ;;  %v673_v42 = vsel %vm609_vm0, %v581_v14, 0.0  ;;  %v687_v43 = vsel %vm609_vm0, %v582_v15, 0.0  ;;  %v2073_v13 = vld [vmem:[%s2784_s6 + $0x4] ss:$8 sps:$4 sm:$0xff]   ;;  %p2274_p7 = scmp.ne.s32.totalorder %s1600_s26, %s2273_s16 }
  0xdd   : > { %v646_v40 = vrot.slane %v645_v39, 4  ;;  %v620_v44 = vrot.slane %v619_v37, 2  ;;  %v633_v45 = vadd.f32 %v632_v38, %v631_v35  ;;  %v660_v46 = vrot.slane %v659_v41, 4  ;;  %1231 = vmatprep.mubr.bf16.mxu0 %v2073_v13  ;;  %s2426_s4 = smov [#allocation13]  }
  0xde   : > { %v674_v47 = vrot.slane %v673_v42, 4  ;;  %v688_v49 = vrot.slane %v687_v43, 4  ;;  %v701_v50 = vsel %vm609_vm0, %v583_v20, 0.0  ;;  %v715_v51 = vsel %vm609_vm0, %v584_v21, 0.0  ;;  %p3271_p12 = scmp.ne.s32.totalorder %s3268_s10, 0  ;;  %s2277_s15 = sshll.u32 %s2426_s4, 4  ;;  %s2278_s15 = int_to_ptr.vmem [resolvable:$false] %s2277_s15 }
  0xdf   : > { %v647_v48 = vadd.f32 %v646_v40, %v645_v39  ;;  %v621_v52 = vadd.f32 %v620_v44, %v619_v37  ;;  %v634_v53 = vrot.slane %v633_v45, 2  ;;  %v661_v54 = vadd.f32 %v660_v46, %v659_v41  ;;  %s2279_s25 = scalar_lea.vmem %s2278_s15, 256  ;;  %p2280_p9 = scmp.lt.s32.totalorder %s1600_s26, %s2278_s15 }
  0xe0   : > { %v675_v55 = vadd.f32 %v674_v47, %v673_v42  ;;  %v689_v57 = vadd.f32 %v688_v49, %v687_v43  ;;  %v702_v58 = vrot.slane %v701_v50, 4  ;;  %v716_v59 = vrot.slane %v715_v51, 4  ;;  %s3075_s29 = scalar_lea.hbm %s3270_s24, %s3069_s1  ;;  %p2275_p2 = pnand %p2274_p7, %p3271_p12 }
  0xe1   : > { %v648_v56 = vrot.slane %v647_v48, 2  ;;  %v622_v60 = vrot.slane %v621_v52, 1  ;;  %v635_v61 = vadd.f32 %v634_v53, %v633_v45  ;;  %v662_v62 = vrot.slane %v661_v54, 2  ;;  %p2281_p10 = scmp.lt.s32.totalorder %s2279_s25, %s2273_s16 }
  0xe2   : > { %v676_v63 = vrot.slane %v675_v55, 2  ;;  %v690_v6 = vrot.slane %v689_v57, 2  ;;  %v703_v7 = vadd.f32 %v702_v58, %v701_v50  ;;  %v717_v8 = vadd.f32 %v716_v59, %v715_v51  ;;  %p2276_p6 = pneg %p2275_p2 }
  0xe3   : > { %v649_v0 = vadd.f32 %v648_v56, %v647_v48  ;;  %v2883_v14 = vadd.f32 %v622_v60, %v621_v52  ;;  %v636_v15 = vrot.slane %v635_v61, 1  ;;  %v663_v20 = vadd.f32 %v662_v62, %v661_v54  ;;  %p2282_p4 = por %p2281_p10, %p2280_p9 }
  0xe4   : > { %v677_v21 = vadd.f32 %v676_v63, %v675_v55  ;;  %v691_v30 = vadd.f32 %v690_v6, %v689_v57  ;;  %v704_v35 = vrot.slane %v703_v7, 2  ;;  %v718_v37 = vrot.slane %v717_v8, 2 }
  0xe5   : > { %v650_v23 = vrot.slane %v649_v0, 1  ;;  %v2885_v38 = vadd.f32 %v636_v15, %v635_v61  ;;  %v664_v39 = vrot.slane %v663_v20, 1  ;;  %v729_v41 = vsel %vm609_vm0, %v585_v22, 0.0  ;;  %p2283_p5 = pnand %p2282_p4, %p2276_p6 }
  0xe6   : > { %v678_v40 = vrot.slane %v677_v21, 1  ;;  %v692_v43 = vrot.slane %v691_v30, 1  ;;  %v705_v44 = vadd.f32 %v704_v35, %v703_v7  ;;  %v719_v45 = vadd.f32 %v718_v37, %v717_v8 }
  0xe7   : > { %v2888_v42 = vadd.f32 %v650_v23, %v649_v0  ;;  %v2890_v46 = vadd.f32 %v664_v39, %v663_v20  ;;  %v730_v48 = vrot.slane %v729_v41, 4  ;;  %v743_v49 = vsel %vm609_vm0, %v586_v27, 0.0 }
  0xe8   : > { %v2892_v47 = vadd.f32 %v678_v40, %v677_v21  ;;  %v2895_v50 = vadd.f32 %v692_v43, %v691_v30  ;;  %v706_v51 = vrot.slane %v705_v44, 1  ;;  %v720_v52 = vrot.slane %v719_v45, 1  ;;  %v2088_v43 = vld [vmem:[%s2784_s6 + $0x64] ss:$8 sps:$4 sm:$0xff]  }
  0xe9   : > { %v744_v53 = vrot.slane %v743_v49, 4  ;;  %v731_v54 = vadd.f32 %v730_v48, %v729_v41  ;;  %v757_v22 = vsel %vm609_vm0, %v587_v28, 0.0  ;;  %v771_v55 = vsel %vm609_vm0, %v588_v29, 0.0  ;;  %1279 = vmatprep.mubr.bf16.mxu1 %v2088_v43 }
  0xea   : > { %v785_v27 = vsel %vm609_vm0, %v589_v32, 0.0  ;;  %v707_v56 = vadd.f32 %v706_v51, %v705_v44  ;;  %v721_v57 = vadd.f32 %v720_v52, %v719_v45  ;;  %v758_v59 = vrot.slane %v757_v22, 4 }
  0xeb   : > { %v745_v58 = vadd.f32 %v744_v53, %v743_v49  ;;  %v732_v60 = vrot.slane %v731_v54, 2  ;;  %v772_v61 = vrot.slane %v771_v55, 4  ;;  %v786_v62 = vrot.slane %v785_v27, 4 }
  0xec   : > { %v799_v28 = vsel %vm609_vm0, %v590_v33, 0.0  ;;  %v759_v0 = vadd.f32 %v758_v59, %v757_v22  ;;  %v813_v32 = vsel %vm609_vm0, %v591_v34, 0.0  ;;  %v827_v33 = vsel %vm609_vm0, %v592_v36, 0.0 }
  0xed   : > { %v746_v63 = vrot.slane %v745_v58, 2  ;;  %v800_v29 = vrot.slane %v799_v28, 4  ;;  %v733_v6 = vadd.f32 %v732_v60, %v731_v54  ;;  %v773_v7 = vadd.f32 %v772_v61, %v771_v55 }
  0xee   : > { %v787_v8 = vadd.f32 %v786_v62, %v785_v27  ;;  %v814_v13 = vrot.slane %v813_v32, 4  ;;  %v760_v20 = vrot.slane %v759_v0, 2  ;;  %v828_v41 = vrot.slane %v827_v33, 4 }
  0xef   : > { %v747_v15 = vadd.f32 %v746_v63, %v745_v58  ;;  %v801_v21 = vadd.f32 %v800_v29, %v799_v28  ;;  %v734_v23 = vrot.slane %v733_v6, 1  ;;  %v774_v30 = vrot.slane %v773_v7, 2 }
  0xf0   : > { %v788_v35 = vrot.slane %v787_v8, 2  ;;  %v815_v37 = vadd.f32 %v814_v13, %v813_v32  ;;  %v761_v34 = vadd.f32 %v760_v20, %v759_v0  ;;  %v829_v36 = vadd.f32 %v828_v41, %v827_v33 }
  0xf1   : > { %v748_v39 = vrot.slane %v747_v15, 1  ;;  %v802_v40 = vrot.slane %v801_v21, 2  ;;  %v735_v44 = vadd.f32 %v734_v23, %v733_v6  ;;  %v775_v45 = vadd.f32 %v774_v30, %v773_v7 }
  0xf2   : > { %v789_v48 = vadd.f32 %v788_v35, %v787_v8  ;;  %v816_v49 = vrot.slane %v815_v37, 2  ;;  %v762_v52 = vrot.slane %v761_v34, 1  ;;  %vm1034_vm4 = vcmask 1044484  }
  0xf3   : > { %v749_v51 = vadd.f32 %v748_v39, %v747_v15  ;;  %v803_v53 = vadd.f32 %v802_v40, %v801_v21  ;;  %v776_v54 = vrot.slane %v775_v45, 1  ;;  %v836_v27 = vmul.f32 0.25, %v2883_v14 }
  0xf4   : > { %v790_v22 = vrot.slane %v789_v48, 1  ;;  %v817_v55 = vadd.f32 %v816_v49, %v815_v37  ;;  %vm1036_vm5 = vcmask 1045509   ;;  %v763_v58 = vadd.f32 %v762_v52, %v761_v34 }
  0xf5   : > { %v804_v59 = vrot.slane %v803_v53, 1  ;;  %v830_v60 = vrot.slane %v829_v36, 2  ;;  %v838_v61 = vmul.f32 0.25, %v2885_v38  ;;  %vm1038_vm6 = vcmask 1046534  }
  0xf6   : > { %v777_v62 = vadd.f32 %v776_v54, %v775_v45  ;;  %v791_v28 = vadd.f32 %v790_v22, %v789_v48  ;;  %v818_v63 = vrot.slane %v817_v55, 1  ;;  %v840_v0 = vmul.f32 0.25, %v2888_v42 }
  0xf7   : > { %vm1040_vm7 = vcmask 1047559   ;;  %v805_v29 = vadd.f32 %v804_v59, %v803_v53  ;;  %v831_v32 = vadd.f32 %v830_v60, %v829_v36  ;;  %v842_v6 = vmul.f32 0.25, %v2890_v46 }
  0xf8   : > { %v844_v7 = vmul.f32 0.25, %v2892_v47  ;;  %v819_v14 = vadd.f32 %v818_v63, %v817_v55  ;;  %v846_v8 = vmul.f32 0.25, %v2895_v50  ;;  %v848_v13 = vmul.f32 0.25, %v707_v56 }
  0xf9   : > { %v850_v15 = vmul.f32 0.25, %v721_v57  ;;  %v832_v20 = vrot.slane %v831_v32, 1  ;;  %v852_v38 = vmul.f32 0.25, %v735_v44  ;;  %v854_v21 = vmul.f32 0.25, %v749_v51 }
  0xfa   : > { %v856_v33 = vmul.f32 0.25, %v763_v58  ;;  %v858_v23 = vmul.f32 0.25, %v777_v62  ;;  %v860_v30 = vmul.f32 0.25, %v791_v28  ;;  %v862_v35 = vmul.f32 0.25, %v805_v29 }
  0xfb   : > { %v864_v42 = vmul.f32 0.25, %v819_v14  ;;  %v833_v37 = vadd.f32 %v832_v20, %v831_v32  ;;  %v1042_v39 = vsel %vm1028_vm1, %v838_v61, %v836_v27  ;;  %v1056_v46 = vsel %vm1028_vm1, %v854_v21, %v852_v38 }
  0xfc   : > { %v612_v47 = vadd.f32 %v611_v16, %v2815_v9  ;;  %v1043_v50 = vsel %vm1030_vm2, %v840_v0, %v1042_v39  ;;  %v1057_v56 = vsel %vm1030_vm2, %v856_v33, %v1056_v46  ;;  %v624_v57 = vsel %vm609_vm0, %v2796_v1, 0.0 }
  0xfd   : > { %v638_v34 = vsel %vm609_vm0, %v2799_v2, 0.0  ;;  %v866_v40 = vmul.f32 0.25, %v833_v37  ;;  %v1044_v41 = vsel %vm1032_vm3, %v842_v6, %v1043_v50  ;;  %v1058_v43 = vsel %vm1032_vm3, %v858_v23, %v1057_v56 }
  0xfe   : > { %v613_v44 = vrot.slane %v612_v47, 2  ;;  %v1045_v45 = vsel %vm1034_vm4, %v844_v7, %v1044_v41  ;;  %v1059_v9 = vsel %vm1034_vm4, %v860_v30, %v1058_v43  ;;  %v625_v16 = vrot.slane %v624_v57, 4 }
  0xff   : > { %v639_v48 = vrot.slane %v638_v34, 4  ;;  %v1046_v49 = vsel %vm1036_vm5, %v846_v8, %v1045_v45  ;;  %v1060_v51 = vsel %vm1036_vm5, %v862_v35, %v1059_v9  ;;  %v652_v2 = vsel %vm609_vm0, %v2802_v3, 0.0 }
 0x100   : > { %v614_v1 = vadd.f32 %v613_v44, %v612_v47  ;;  %v1047_v52 = vsel %vm1038_vm6, %v848_v13, %v1046_v49  ;;  %v1061_v53 = vsel %vm1038_vm6, %v864_v42, %v1060_v51  ;;  %v626_v36 = vadd.f32 %v625_v16, %v624_v57 }
 0x101   : > { %v640_v54 = vadd.f32 %v639_v48, %v638_v34  ;;  %v1048_v22 = vsel %vm1040_vm7, %v850_v15, %v1047_v52  ;;  %v1062_v55 = vsel %vm1040_vm7, %v866_v40, %v1061_v53  ;;  %v653_v58 = vrot.slane %v652_v2, 4 }
 0x102   : > { %v615_v27 = vrot.slane %v614_v1, 1  ;;  %v1100_v59 = vpack.c.bf16 %v1062_v55, %v1048_v22  ;;  %v627_v60 = vrot.slane %v626_v36, 2  ;;  %v666_v62 = vsel %vm609_vm0, %v2805_v4, 0.0 }
 0x103   : > { %v641_v61 = vrot.slane %v640_v54, 2  ;;  %v654_v3 = vadd.f32 %v653_v58, %v652_v2  ;;  %v667_v63 = vrot.slane %v666_v62, 4  ;;  %v680_v0 = vsel %vm609_vm0, %v2808_v5, 0.0 }
 0x104   : > { %v2953_v28 = vadd.f32 %v615_v27, %v614_v1  ;;  %1199 = vmatprep.subr.bf16.mxu0 %v1100_v59  ;;  %v628_v29 = vadd.f32 %v627_v60, %v626_v36  ;;  %v681_v6 = vrot.slane %v680_v0, 4  ;;  %v694_v7 = vsel %vm609_vm0, %v2818_v10, 0.0  ;;  %1947 = vmatprep.subr.bf16.mxu1 %v1100_v59 }
 0x105   : > { %v642_v32 = vadd.f32 %v641_v61, %v640_v54  ;;  %v655_v14 = vrot.slane %v654_v3, 2  ;;  %v668_v8 = vadd.f32 %v667_v63, %v666_v62  ;;  %v695_v13 = vrot.slane %v694_v7, 4 }
 0x106   : > { %v708_v4 = vsel %vm609_vm0, %v2821_v11, 0.0  ;;  %v629_v15 = vrot.slane %v628_v29, 1  ;;  %v682_v38 = vadd.f32 %v681_v6, %v680_v0  ;;  %v722_v30 = vsel %vm609_vm0, %v2824_v12, 0.0 }
 0x107   : > { %v643_v20 = vrot.slane %v642_v32, 1  ;;  %v709_v21 = vrot.slane %v708_v4, 4  ;;  %v656_v33 = vadd.f32 %v655_v14, %v654_v3  ;;  %v669_v5 = vrot.slane %v668_v8, 2 }
 0x108   : > { %v696_v23 = vadd.f32 %v695_v13, %v694_v7  ;;  %v2963_v35 = vadd.f32 %v629_v15, %v628_v29  ;;  %v683_v42 = vrot.slane %v682_v38, 2  ;;  %v723_v11 = vrot.slane %v722_v30, 4 }
 0x109   : > { %v2965_v10 = vadd.f32 %v643_v20, %v642_v32  ;;  %v710_v37 = vadd.f32 %v709_v21, %v708_v4  ;;  %v657_v39 = vrot.slane %v656_v33, 1  ;;  %v670_v46 = vadd.f32 %v669_v5, %v668_v8 }
 0x10a   : > { %v697_v47 = vrot.slane %v696_v23, 2  ;;  %v684_v50 = vadd.f32 %v683_v42, %v682_v38  ;;  %v736_v57 = vsel %vm609_vm0, %v2834_v17, 0.0  ;;  %v750_v34 = vsel %vm609_vm0, %v2837_v18, 0.0 }
 0x10b   : > { %v711_v56 = vrot.slane %v710_v37, 2  ;;  %v658_v40 = vadd.f32 %v657_v39, %v656_v33  ;;  %v671_v12 = vrot.slane %v670_v46, 1  ;;  %v724_v43 = vadd.f32 %v723_v11, %v722_v30 }
 0x10c   : > { %v698_v41 = vadd.f32 %v697_v47, %v696_v23  ;;  %v685_v44 = vrot.slane %v684_v50, 1  ;;  %v737_v9 = vrot.slane %v736_v57, 4  ;;  %v751_v16 = vrot.slane %v750_v34, 4 }
 0x10d   : > { %v712_v45 = vadd.f32 %v711_v56, %v710_v37  ;;  %v672_v48 = vadd.f32 %v671_v12, %v670_v46  ;;  %v725_v51 = vrot.slane %v724_v43, 2  ;;  %v764_v1 = vsel %vm609_vm0, %v2840_v19, 0.0 }
 0x10e   : > { %v699_v49 = vrot.slane %v698_v41, 1  ;;  %v686_v2 = vadd.f32 %v685_v44, %v684_v50  ;;  %v738_v17 = vadd.f32 %v737_v9, %v736_v57  ;;  %v752_v53 = vadd.f32 %v751_v16, %v750_v34  ;;  %v868_v9 = vld [vmem:[%s2778_s27 + $0x8] sm:$0xff] }
 0x10f   : > { %v713_v52 = vrot.slane %v712_v45, 1  ;;  %v726_v18 = vadd.f32 %v725_v51, %v724_v43  ;;  %v765_v54 = vrot.slane %v764_v1, 4  ;;  %v778_v22 = vsel %vm609_vm0, %v2850_v24, 0.0 }
 0x110   : > { %v700_v36 = vadd.f32 %v699_v49, %v698_v41  ;;  %v739_v27 = vrot.slane %v738_v17, 2  ;;  %v753_v58 = vrot.slane %v752_v53, 2  ;;  %v779_v59 = vrot.slane %v778_v22, 4 }
 0x111   : > { %v714_v55 = vadd.f32 %v713_v52, %v712_v45  ;;  %v727_v60 = vrot.slane %v726_v18, 1  ;;  %v766_v61 = vadd.f32 %v765_v54, %v764_v1  ;;  %v792_v62 = vsel %vm609_vm0, %v2853_v25, 0.0 }
 0x112   : > { %v806_v19 = vsel %vm609_vm0, %v2856_v26, 0.0  ;;  %v740_v3 = vadd.f32 %v739_v27, %v738_v17  ;;  %v754_v63 = vadd.f32 %v753_v58, %v752_v53  ;;  %v780_v0 = vadd.f32 %v779_v59, %v778_v22  ;;  %v870_v17 = vld [vmem:[%s2778_s27 + $0x18] sm:$0xff] }
 0x113   : > { %v793_v29 = vrot.slane %v792_v62, 4  ;;  %v728_v32 = vadd.f32 %v727_v60, %v726_v18  ;;  %v767_v6 = vrot.slane %v766_v61, 2  ;;  %v807_v7 = vrot.slane %v806_v19, 4  ;;  %v872_v18 = vld [vmem:[%s2778_s27 + $0x28] sm:$0xff] }
 0x114   : > { %v820_v24 = vsel %vm609_vm0, %v2865_v31, 0.0  ;;  %v741_v14 = vrot.slane %v740_v3, 1  ;;  %v755_v8 = vrot.slane %v754_v63, 1  ;;  %v781_v13 = vrot.slane %v780_v0, 2 }
 0x115   : > { %v794_v4 = vadd.f32 %v793_v29, %v792_v62  ;;  %v768_v15 = vadd.f32 %v767_v6, %v766_v61  ;;  %v808_v20 = vadd.f32 %v807_v7, %v806_v19  ;;  %v821_v25 = vrot.slane %v820_v24, 4  ;;  %v874_v61 = vld [vmem:[%s2778_s27 + $0x38] sm:$0xff]  ;;  %v876_v29 = vld [vmem:[%s2778_s27 + $0x48] sm:$0xff] }
 0x116   : > { %v835_v38 = vmul.f32 0.25, %v2953_v28  ;;  %v742_v26 = vadd.f32 %v741_v14, %v740_v3  ;;  %v756_v21 = vadd.f32 %v755_v8, %v754_v63  ;;  %v782_v33 = vadd.f32 %v781_v13, %v780_v0 }
 0x117   : > { %v795_v5 = vrot.slane %v794_v4, 2  ;;  %v769_v23 = vrot.slane %v768_v15, 1  ;;  %v809_v30 = vrot.slane %v808_v20, 2  ;;  %v822_v42 = vadd.f32 %v821_v25, %v820_v24  ;;  %v878_v24 = vld [vmem:[%s2778_s27 + $0x58] sm:$0xff] }
 0x118   : > { %v837_v37 = vmul.f32 0.25, %v2963_v35  ;;  %v783_v39 = vrot.slane %v782_v33, 1  ;;  %v839_v46 = vmul.f32 0.25, %v2965_v10  ;;  %v841_v47 = vmul.f32 0.25, %v658_v40 }
 0x119   : > { %v796_v31 = vadd.f32 %v795_v5, %v794_v4  ;;  %v770_v11 = vadd.f32 %v769_v23, %v768_v15  ;;  %v810_v50 = vadd.f32 %v809_v30, %v808_v20  ;;  %v823_v56 = vrot.slane %v822_v42, 2  ;;  %v880_v15 = vld [vmem:[%s2778_s27 + $0x68] sm:$0xff] }
 0x11a   : > { %v843_v57 = vmul.f32 0.25, %v672_v48  ;;  %v784_v28 = vadd.f32 %v783_v39, %v782_v33  ;;  %v845_v12 = vmul.f32 0.25, %v686_v2  ;;  %v847_v41 = vmul.f32 0.25, %v700_v36 }
 0x11b   : > { %v797_v34 = vrot.slane %v796_v31, 1  ;;  %v811_v43 = vrot.slane %v810_v50, 1  ;;  %v824_v44 = vadd.f32 %v823_v56, %v822_v42  ;;  %v849_v45 = vmul.f32 0.25, %v714_v55 }
 0x11c   : > { %v851_v35 = vmul.f32 0.25, %v728_v32  ;;  %v853_v49 = vmul.f32 0.25, %v742_v26  ;;  %v855_v51 = vmul.f32 0.25, %v756_v21  ;;  %v857_v10 = vmul.f32 0.25, %v770_v11  ;;  %v882_v26 = vld [vmem:[%s2778_s27 + $0x78] sm:$0xff] }
 0x11d   : > { %v798_v16 = vadd.f32 %v797_v34, %v796_v31  ;;  %v812_v40 = vadd.f32 %v811_v43, %v810_v50  ;;  %v825_v1 = vrot.slane %v824_v44, 1  ;;  %v859_v52 = vmul.f32 0.25, %v784_v28 }
 0x11e   : > { %v1029_v48 = vsel %vm1028_vm1, %v837_v37, %v835_v38  ;;  %v1049_v36 = vsel %vm1028_vm1, %v853_v49, %v851_v35  ;;  %v889_v54 = vrot.slane %v868_v9, 4  ;;  %v901_v19 = vrot.slane %v870_v17, 4 }
 0x11f   : > { %v861_v53 = vmul.f32 0.25, %v798_v16  ;;  %v1031_v2 = vsel %vm1030_vm2, %v839_v46, %v1029_v48  ;;  %v826_v22 = vadd.f32 %v825_v1, %v824_v44  ;;  %v863_v55 = vmul.f32 0.25, %v812_v40 }
 0x120   : > { %v1033_v27 = vsel %vm1032_vm3, %v841_v47, %v1031_v2  ;;  %v1050_v58 = vsel %vm1030_vm2, %v855_v51, %v1049_v36  ;;  %v890_v62 = vadd.f32 %v889_v54, %v868_v9  ;;  %v913_v32 = vrot.slane %v872_v18, 4  ;;  %v867_v9 = vld [vmem:[%s2778_s27] sm:$0xff] }
 0x121   : > { %v1035_v59 = vsel %vm1034_vm4, %v843_v57, %v1033_v27  ;;  %v1051_v60 = vsel %vm1032_vm3, %v857_v10, %v1050_v58  ;;  %v865_v3 = vmul.f32 0.25, %v826_v22  ;;  %v902_v8 = vadd.f32 %v901_v19, %v870_v17  ;;  %v869_v27 = vld [vmem:[%s2778_s27 + $0x10] sm:$0xff] }
 0x122   : > { %v1037_v63 = vsel %vm1036_vm5, %v845_v12, %v1035_v59  ;;  %v1052_v0 = vsel %vm1034_vm4, %v859_v52, %v1051_v60  ;;  %v891_v14 = vrot.slane %v890_v62, 2  ;;  %v914_v20 = vadd.f32 %v913_v32, %v872_v18 }
 0x123   : > { %v1039_v6 = vsel %vm1038_vm6, %v847_v41, %v1037_v63  ;;  %v1053_v7 = vsel %vm1036_vm5, %v861_v53, %v1052_v0  ;;  %v925_v25 = vrot.slane %v874_v61, 4  ;;  %v903_v33 = vrot.slane %v902_v8, 2 }
 0x124   : > { %v1041_v13 = vsel %vm1040_vm7, %v849_v45, %v1039_v6  ;;  %v1054_v4 = vsel %vm1038_vm6, %v863_v55, %v1053_v7  ;;  %v892_v21 = vadd.f32 %v891_v14, %v890_v62  ;;  %v937_v5 = vrot.slane %v876_v29, 4  ;;  %v873_v6 = vld [vmem:[%s2778_s27 + $0x30] sm:$0xff] }
 0x125   : > { %v1055_v38 = vsel %vm1040_vm7, %v865_v3, %v1054_v4  ;;  %v915_v30 = vrot.slane %v914_v20, 2  ;;  %v926_v42 = vadd.f32 %v925_v25, %v874_v61  ;;  %v949_v37 = vrot.slane %v878_v24, 4  ;;  %v871_v61 = vld [vmem:[%s2778_s27 + $0x20] sm:$0xff] }
 0x126   : > { %v1099_v23 = vpack.c.bf16 %v1055_v38, %v1041_v13  ;;  %v893_v39 = vrot.slane %v892_v21, 1  ;;  %v904_v31 = vadd.f32 %v903_v33, %v902_v8  ;;  %v938_v46 = vadd.f32 %v937_v5, %v876_v29  ;;  %v875_v4 = vld [vmem:[%s2778_s27 + $0x40] sm:$0xff]  ;;  %v877_v38 = vld [vmem:[%s2778_s27 + $0x50] sm:$0xff] }
 0x127   : > { %v961_v47 = vrot.slane %v880_v15, 4  ;;  %v916_v11 = vadd.f32 %v915_v30, %v914_v20  ;;  %v927_v50 = vrot.slane %v926_v42, 2  ;;  %v950_v56 = vadd.f32 %v949_v37, %v878_v24  ;;  %v879_v37 = vld [vmem:[%s2778_s27 + $0x60] sm:$0xff] }
 0x128   : > { %1200 = vmatpush1.bf16.xpose.msra.mxu0 %v1099_v23  ;;  %v973_v57 = vrot.slane %v882_v26, 4  ;;  %1949 = vmatpush1.bf16.xpose.msra.mxu1 %v1099_v23  ;;  %v894_v28 = vadd.f32 %v893_v39, %v892_v21  ;;  %v905_v34 = vrot.slane %v904_v31, 1  ;;  %v939_v12 = vrot.slane %v938_v46, 2 }
 0x129   : > { %v962_v41 = vadd.f32 %v961_v47, %v880_v15  ;;  %v917_v43 = vrot.slane %v916_v11, 1  ;;  %v928_v44 = vadd.f32 %v927_v50, %v926_v42  ;;  %v951_v45 = vrot.slane %v950_v56, 2 }
 0x12a   : > { %v974_v35 = vadd.f32 %v973_v57, %v882_v26  ;;  %v906_v16 = vadd.f32 %v905_v34, %v904_v31  ;;  %v940_v49 = vadd.f32 %v939_v12, %v938_v46  ;;  %v981_v10 = vmul.f32 0.125, %v894_v28 }
 0x12b   : > { %v963_v51 = vrot.slane %v962_v41, 2  ;;  %v918_v40 = vadd.f32 %v917_v43, %v916_v11  ;;  %v929_v1 = vrot.slane %v928_v44, 1  ;;  %v952_v52 = vadd.f32 %v951_v45, %v950_v56  ;;  %v881_v11 = vld [vmem:[%s2778_s27 + $0x70] sm:$0xff] }
 0x12c   : > { %v975_v48 = vrot.slane %v974_v35, 2  ;;  %v941_v17 = vrot.slane %v940_v49, 1  ;;  %v983_v2 = vmul.f32 0.125, %v906_v16  ;;  %v883_v36 = vrot.slane %v867_v9, 4 }
 0x12d   : > { %v964_v53 = vadd.f32 %v963_v51, %v962_v41  ;;  %v930_v18 = vadd.f32 %v929_v1, %v928_v44  ;;  %v953_v54 = vrot.slane %v952_v52, 1  ;;  %v985_v55 = vmul.f32 0.125, %v918_v40 }
 0x12e   : > { %v976_v22 = vadd.f32 %v975_v48, %v974_v35  ;;  %v942_v58 = vadd.f32 %v941_v17, %v940_v49  ;;  %v1090_v60 = vsel %vm1028_vm1, %v983_v2, %v981_v10  ;;  %v884_v62 = vadd.f32 %v883_v36, %v867_v9 }
 0x12f   : > { %v965_v59 = vrot.slane %v964_v53, 1  ;;  %v954_v19 = vadd.f32 %v953_v54, %v952_v52  ;;  %v987_v63 = vmul.f32 0.125, %v930_v18  ;;  %v1091_v0 = vsel %vm1030_vm2, %v985_v55, %v1090_v60 }
 0x130   : > { %v977_v3 = vrot.slane %v976_v22, 1  ;;  %v989_v32 = vmul.f32 0.125, %v942_v58  ;;  %v885_v7 = vrot.slane %v884_v62, 2  ;;  %v895_v24 = vrot.slane %v869_v27, 4 }
 0x131   : > { %v966_v29 = vadd.f32 %v965_v59, %v964_v53  ;;  %v991_v8 = vmul.f32 0.125, %v954_v19  ;;  %v1092_v13 = vsel %vm1032_vm3, %v987_v63, %v1091_v0  ;;  %v907_v15 = vrot.slane %v871_v61, 4 }
 0x132   : > { %v978_v14 = vadd.f32 %v977_v3, %v976_v22  ;;  %v1093_v25 = vsel %vm1034_vm4, %v989_v32, %v1092_v13  ;;  %v886_v26 = vadd.f32 %v885_v7, %v884_v62  ;;  %v896_v21 = vadd.f32 %v895_v24, %v869_v27 }
 0x133   : > { %v993_v20 = vmul.f32 0.125, %v966_v29  ;;  %v1094_v5 = vsel %vm1036_vm5, %v991_v8, %v1093_v25  ;;  %v908_v23 = vadd.f32 %v907_v15, %v871_v61  ;;  %v919_v30 = vrot.slane %v873_v6, 4 }
 0x134   : > { %v995_v33 = vmul.f32 0.125, %v978_v14  ;;  %v887_v39 = vrot.slane %v886_v26, 1  ;;  %v897_v31 = vrot.slane %v896_v21, 2  ;;  %v931_v46 = vrot.slane %v875_v4, 4 }
 0x135   : > { %v1095_v42 = vsel %vm1038_vm6, %v993_v20, %v1094_v5  ;;  %v909_v50 = vrot.slane %v908_v23, 2  ;;  %v920_v56 = vadd.f32 %v919_v30, %v873_v6  ;;  %v943_v57 = vrot.slane %v877_v38, 4  ;;  %v2086_v5 = vld [vmem:[%s2784_s6 + $0x60] ss:$8 sps:$4 sm:$0xff]   ;;  %v2092_v30 = vld [vmem:[%s2784_s6 + $0x74] ss:$8 sps:$4 sm:$0xff]  }
 0x136   : > { %v1096_v47 = vsel %vm1040_vm7, %v995_v33, %v1095_v42  ;;  %v888_v34 = vadd.f32 %v887_v39, %v886_v26  ;;  %v898_v12 = vadd.f32 %v897_v31, %v896_v21  ;;  %v932_v41 = vadd.f32 %v931_v46, %v875_v4  ;;  %v2071_v33 = vld [vmem:[%s2784_s6] ss:$8 sps:$4 sm:$0xff]   ;;  %v2076_v42 = vld [vmem:[%s2784_s6 + $0x10] ss:$8 sps:$4 sm:$0xff]   ;;  %v2077_v39 = vld [vmem:[%s2784_s6 + $0x24] ss:$8 sps:$4 sm:$0xff]  }
 0x137   : > { %v1102_v28 = vpack.c.bf16 %v1096_v47, %v1096_v47  ;;  %v910_v43 = vadd.f32 %v909_v50, %v908_v23  ;;  %v921_v44 = vrot.slane %v920_v56, 2  ;;  %v944_v45 = vadd.f32 %v943_v57, %v877_v38  ;;  %v2074_v23 = vld [vmem:[%s2784_s6 + $0x14] ss:$8 sps:$4 sm:$0xff]   ;;  %v2079_v31 = vld [vmem:[%s2784_s6 + $0x20] ss:$8 sps:$4 sm:$0xff]  }
 0x138   : > { %v955_v35 = vrot.slane %v879_v37, 4  ;;  %v899_v9 = vrot.slane %v898_v12, 1  ;;  %v933_v16 = vrot.slane %v932_v41, 2  ;;  %v967_v49 = vrot.slane %v881_v11, 4  ;;  %v2080_v46 = vld [vmem:[%s2784_s6 + $0x34] ss:$8 sps:$4 sm:$0xff]  }
 0x139   : > { %1201 = vmatprep.subr.bf16.mxu0 %v1102_v28  ;;  %1948 = vmatprep.subr.bf16.mxu1 %v1102_v28  ;;  %v911_v51 = vrot.slane %v910_v43, 1  ;;  %v922_v10 = vadd.f32 %v921_v44, %v920_v56  ;;  %v945_v40 = vrot.slane %v944_v45, 2  ;;  %v980_v53 = vmul.f32 0.125, %v888_v34  ;;  %v2082_v47 = vld [vmem:[%s2784_s6 + $0x30] ss:$8 sps:$4 sm:$0xff]   ;;  %v1313_v28 = vld [vmem:[#allocation8] sm:$0xff] }
 0x13a   : > { %v956_v1 = vadd.f32 %v955_v35, %v879_v37  ;;  %v900_v52 = vadd.f32 %v899_v9, %v898_v12  ;;  %v934_v48 = vadd.f32 %v933_v16, %v932_v41  ;;  %v968_v17 = vadd.f32 %v967_v49, %v881_v11  ;;  %v2094_v37 = vld [vmem:[%s2784_s6 + $0x70] ss:$8 sps:$4 sm:$0xff]   ;;  %v2083_v11 = vld [vmem:[%s2784_s6 + $0x44] ss:$8 sps:$4 sm:$0xff]   ;;  %v2085_v50 = vld [vmem:[%s2784_s6 + $0x40] ss:$8 sps:$4 sm:$0xff]  }
 0x13b   : > { %v912_v2 = vadd.f32 %v911_v51, %v910_v43  ;;  %v923_v36 = vrot.slane %v922_v10, 1  ;;  %v946_v18 = vadd.f32 %v945_v40, %v944_v45  ;;  %v2089_v56 = vld [vmem:[%s2784_s6 + $0x54] ss:$8 sps:$4 sm:$0xff]   ;;  %v2091_v57 = vld [vmem:[%s2784_s6 + $0x50] ss:$8 sps:$4 sm:$0xff]   ;;  %v1314_v34 = vld [vmem:[#allocation8 + $0x8] sm:$0xff] }
 0x13c   : > { %v957_v54 = vrot.slane %v956_v1, 2  ;;  %v935_v22 = vrot.slane %v934_v48, 1  ;;  %v969_v55 = vrot.slane %v968_v17, 2  ;;  %v982_v27 = vmul.f32 0.125, %v900_v52  ;;  %v1315_v44 = vld [vmem:[#allocation8 + $0x10] sm:$0xff] }
 0x13d   : > { %v924_v58 = vadd.f32 %v923_v36, %v922_v10  ;;  %v947_v59 = vrot.slane %v946_v18, 1  ;;  %v984_v61 = vmul.f32 0.125, %v912_v2  ;;  %v2423_v12 = vmov 0.0|0.0  }
 0x13e   : > { %v958_v60 = vadd.f32 %v957_v54, %v956_v1  ;;  %v936_v62 = vadd.f32 %v935_v22, %v934_v48  ;;  %v970_v19 = vadd.f32 %v969_v55, %v968_v17  ;;  %v1083_v3 = vsel %vm1028_vm1, %v982_v27, %v980_v53 }
 0x13f   : > { %v948_v63 = vadd.f32 %v947_v59, %v946_v18  ;;  %v986_v29 = vmul.f32 0.125, %v924_v58  ;;  %v1084_v32 = vsel %vm1030_vm2, %v984_v61, %v1083_v3  ;;  %v1933_v41 = vpack.c.bf16 %v1314_v34, %v1313_v28 }
 0x140   : > { %v959_v0 = vrot.slane %v958_v60, 1  ;;  %v971_v6 = vrot.slane %v970_v19, 1  ;;  %v988_v7 = vmul.f32 0.125, %v936_v62  ;;  %v2424_v43 = vmov 0.0  }
 0x141   : > { %v990_v14 = vmul.f32 0.125, %v948_v63  ;;  %v1085_v8 = vsel %vm1032_vm3, %v986_v29, %v1084_v32  ;;  %vm2425_vm8 = vmmov 0   ;;  %vm1311_vm9 = vcmask 195584  }
 0x142   : > { %v960_v24 = vadd.f32 %v959_v0, %v958_v60  ;;  %v972_v13 = vadd.f32 %v971_v6, %v970_v19  ;;  %v1086_v4 = vsel %vm1034_vm4, %v988_v7, %v1085_v8  ;;  %vm1408_vm10 = vcmask 261120  }
 0x143   : > { %v1087_v20 = vsel %vm1036_vm5, %v990_v14, %v1086_v4 }
 0x144   : > { %v992_v15 = vmul.f32 0.125, %v960_v24  ;;  %v994_v25 = vmul.f32 0.125, %v972_v13 }
 0x146   : > { %v1088_v38 = vsel %vm1038_vm6, %v992_v15, %v1087_v20 }
 0x147   : > { %v1089_v26 = vsel %vm1040_vm7, %v994_v25, %v1088_v38 }
 0x148   : > { %v1101_v21 = vpack.c.bf16 %v1089_v26, %v1089_v26 }
 0x14a   : > { %1202 = vmatpush1.bf16.xpose.msra.mxu0 %v1101_v21  ;;  %1950 = vmatpush1.bf16.xpose.msra.mxu1 %v1101_v21 }
 0x14b   : > { %1932 = vmatprep.subr.bf16.mxu1 %v2423_v12 }
 0x151   : > { %1232 = vmatmul.mubr.bf16.vlgmr.msra.gmra.mrb[0].mxu0 %v2071_v33  ;;  %1280 = vmatmul.mubr.bf16.vlgmr.msra.gmra.mrb[0].mxu1 %v2086_v5  ;;  %v1397_v5 = vld [vmem:[#allocation10] sm:$0xff] }
 0x152   : > { %1239 = vmatprep.mubr.bf16.mxu0 %v2074_v23  ;;  %1287 = vmatprep.mubr.bf16.mxu1 %v2092_v30  ;;  %v1398_v23 = vld [vmem:[#allocation10 + $0x8] sm:$0xff] }
 0x153   : > { %1934 = vmatpush3.bf16.msra.mxu1 %v1933_v41 }
 0x154   : > { %1905 = vmatprep.subr.mxu1 %v2424_v43 }
 0x157   : > { %1906 = vmatpush3.msra.mxu1 %v1315_v44  ;;  %v1485_v44 = vld [vmem:[#allocation11 + $0x10] sm:$0xff] }
 0x158   : > { %1935 = vmatprep.subr.bf16.mxu1 %v2423_v12 }
 0x159   : > { %1240 = vmatmul.mubr.bf16.gmra.mrb[4].mxu0 %v2076_v42  ;;  %1288 = vmatmul.mubr.bf16.gmra.mrb[4].mxu1 %v2094_v37  ;;  %v1936_v42 = vpack.c.bf16 %v1398_v23, %v1397_v5 }
 0x15a   : > { %1247 = vmatprep.mubr.bf16.mxu0 %v2077_v39  ;;  %1907 = vmatprep.mubr.msk.f32.mxu1 %vm2425_vm8, %v2424_v43  ;;  %v1399_v39 = vld [vmem:[#allocation10 + $0x10] sm:$0xff] }
 0x161   : > { %1248 = vmatmul.mubr.bf16.gmra.mrb[8].mxu0 %v2079_v31  ;;  %v1400_v31 = vld [vmem:[#allocation10 + $0x18] sm:$0xff] }
 0x162   : > { %1255 = vmatprep.mubr.bf16.mxu0 %v2080_v46  ;;  %v1939_v46 = vpack.c.bf16 %v1400_v31, %v1399_v39 }
 0x169   : > { %1256 = vmatmul.mubr.bf16.gmra.mrb[12].mxu0 %v2082_v47  ;;  %v1869_v47 = vld [vmem:[%s3267_s30] ss:$0 sm:$0xff] }
 0x16a   : > { %1263 = vmatprep.mubr.bf16.mxu0 %v2083_v11  ;;  %v1483_v11 = vld [vmem:[#allocation11] sm:$0xff] }
 0x171   : > { %1264 = vmatmul.mubr.bf16.gmra.mrb[16].mxu0 %v2085_v50  ;;  %v1484_v50 = vld [vmem:[#allocation11 + $0x8] sm:$0xff] }
 0x172   : > { %1271 = vmatprep.mubr.bf16.mxu0 %v2089_v56  ;;  %v1942_v34 = vpack.c.bf16 %v1484_v50, %v1483_v11 }
 0x179   : > { %1272 = vmatmul.mubr.bf16.gmra.mrb[20].mxu0 %v2091_v57 }
 0x224   : > { %v1233_v45 = vpop.f32.mrb[0].mxu0  ;;  %v1281_v35 = vpop.f32.mrb[0].mxu1 }
 0x225   : > { %v1235_v9 = vpop.f32.mrb[1].mxu0  ;;  %v1283_v16 = vpop.f32.mrb[1].mxu1 }
 0x226   : > { %v1236_v49 = vpop.f32.mrb[2].mxu0  ;;  %v1284_v51 = vpop.f32.mrb[2].mxu1  ;;  %v1871_v9 = vld [vmem:[%s3269_s3] ss:$0 sm:$0xff] }
 0x227   : > { %v1296_v10 = vmax.f32 %v1233_v45, %v1236_v49  ;;  %v1238_v40 = vpop.f32.mrb[3].mxu0  ;;  %v1286_v1 = vpop.f32.mrb[3].mxu1  ;;  %v1486_v45 = vld [vmem:[#allocation11 + $0x18] sm:$0xff] }
 0x22c   : > { %v1241_v52 = vpop.f32.mrb[4].mxu0  ;;  %v1289_v48 = vpop.f32.mrb[4].mxu1 }
 0x22d   : > { %v1297_v17 = vmax.f32 %v1296_v10, %v1241_v52  ;;  %v1243_v53 = vpop.f32.mrb[5].mxu0  ;;  %v1291_v2 = vpop.f32.mrb[5].mxu1 }
 0x22e   : > { %v1244_v36 = vpop.f32.mrb[6].mxu0  ;;  %v1292_v18 = vpop.f32.mrb[6].mxu1 }
 0x22f   : > { %v1298_v54 = vmax.f32 %v1297_v17, %v1244_v36  ;;  %v1246_v22 = vpop.f32.mrb[7].mxu0  ;;  %v1294_v55 = vpop.f32.mrb[7].mxu1 }
 0x234   : > { %v1249_v27 = vpop.f32.mrb[8].mxu0 }
 0x235   : > { %v1299_v58 = vmax.f32 %v1298_v54, %v1249_v27  ;;  %v1251_v59 = vpop.f32.mrb[9].mxu0 }
 0x236   : > { %v1252_v60 = vpop.f32.mrb[10].mxu0 }
 0x237   : > { %v1300_v61 = vmax.f32 %v1299_v58, %v1252_v60  ;;  %v1254_v62 = vpop.f32.mrb[11].mxu0 }
 0x23c   : > { %v1257_v19 = vpop.f32.mrb[12].mxu0 }
 0x23d   : > { %v1301_v3 = vmax.f32 %v1300_v61, %v1257_v19  ;;  %v1259_v63 = vpop.f32.mrb[13].mxu0 }
 0x23e   : > { %v1260_v0 = vpop.f32.mrb[14].mxu0 }
 0x23f   : > { %v1302_v29 = vmax.f32 %v1301_v3, %v1260_v0  ;;  %v1262_v32 = vpop.f32.mrb[15].mxu0 }
 0x244   : > { %v1265_v6 = vpop.f32.mrb[16].mxu0 }
 0x245   : > { %v1303_v7 = vmax.f32 %v1302_v29, %v1265_v6  ;;  %v1267_v24 = vpop.f32.mrb[17].mxu0 }
 0x246   : > { %v1268_v14 = vpop.f32.mrb[18].mxu0 }
 0x247   : > { %v1304_v8 = vmax.f32 %v1303_v7, %v1268_v14  ;;  %v1270_v13 = vpop.f32.mrb[19].mxu0 }
 0x24c   : > { %v1273_v4 = vpop.f32.mrb[20].mxu0 }
 0x24d   : > { %v1305_v15 = vmax.f32 %v1304_v8, %v1273_v4  ;;  %v1275_v20 = vpop.f32.mrb[21].mxu0 }
 0x24e   : > { %v1276_v25 = vpop.f32.mrb[22].mxu0 }
 0x24f   : > { %v1306_v38 = vmax.f32 %v1305_v15, %v1276_v25  ;;  %v1278_v26 = vpop.f32.mrb[23].mxu0 }
 0x251   : > { %v1307_v21 = vmax.f32 %v1306_v38, %v1281_v35  ;;  %v1945_v35 = vpack.c.bf16 %v1486_v45, %v1485_v44 }
 0x253   : > { %v1308_v33 = vmax.f32 %v1307_v21, %v1284_v51 }
 0x255   : > { %v1309_v30 = vmax.f32 %v1308_v33, %v1289_v48 }
 0x257   : > { %v1310_v37 = vmax.f32 %v1309_v30, %v1292_v18 }
 0x259   : > { %1908 = vmatmul.mubr.msk.f32.vlgmr.msra.gmra.mrb[8].mxu1 %vm1311_vm9, %v1310_v37  ;;  %1312 = vst.msk [vmem:[%s529_s9] sm:$0xff] %vm1311_vm9, %v1310_v37 }
 0x25a   : > { %1937 = vmatpush3.bf16.msra.mxu1 %v1936_v42  ;;  %1918 = vmatprep.mubr.msk.f32.mxu1 %vm2425_vm8, %v2424_v43 }
 0x25b   : > { %1938 = vmatprep.subr.bf16.mxu1 %v2423_v12 }
 0x25e   : > { %1940 = vmatpush3.bf16.msra.mxu1 %v1939_v46 }
 0x25f   : > { %1941 = vmatprep.subr.bf16.mxu1 %v2423_v12 }
 0x32c   : > { %v1392_v56 = vpop.f32.mrb[8].mxu1 }
 0x32d   : > { %v1393_v57 = vadd.f32 %v1869_v47, %v1392_v56  ;;  %v1909_v28 = vpop.f32.mrb[9].mxu1 }
 0x32f   : > { %v1396_v41 = vmax.f32 %v1393_v57, 0.0 }
 0x331   : > { %1919 = vmatmul.mubr.msk.f32.vlgmr.msra.gmra.mrb[10].mxu1 %vm1408_vm10, %v1396_v41 }
 0x332   : > { %1943 = vmatpush3.bf16.msra.mxu1 %v1942_v34  ;;  %1929 = vmatprep.mubr.msk.f32.mxu1 %vm2425_vm8, %v2424_v43 }
 0x333   : > { %1944 = vmatprep.subr.bf16.mxu1 %v2423_v12 }
 0x336   : > { %1946 = vmatpush3.bf16.msra.mxu1 %v1945_v35 }
 0x404   : > { %v1478_v16 = vpop.f32.mrb[10].mxu1 }
 0x405   : > { %v1479_v49 = vadd.f32 %v1871_v9, %v1478_v16  ;;  %v1920_v51 = vpop.f32.mrb[11].mxu1 }
 0x407   : > { %v1482_v10 = vmax.f32 %v1479_v49, 0.0 }
 0x409   : > { %1930 = vmatmul.mubr.msk.f32.vlgmr.msra.gmra.mrb[12].mxu1 %vm1408_vm10, %v1482_v10 }
 0x40a   : > { %2286 = shalt.err (!%p2283_p5)
}
 0x40b   : > { %s2287_s23 = scalar_lea.hbm %s3075_s29, 128  ;;  %s2291_s9 = scalar_lea.hbm %s3270_s24, 256 }
 0x40c   : > { %p2288_p8 = scmp.ne.s32.totalorder %s3075_s29, %s2287_s23  ;;  %p2292_p11 = scmp.lt.u32.totalorder %s3075_s29, %s3270_s24 }
 0x40d   : > { %p2293_p13 = scmp.lt.u32.totalorder %s2291_s9, %s2287_s23  ;;  %p2295_p7 = scmp.lt.u32.totalorder %s2287_s23, %s3075_s29 }
 0x40e   : > { %p2289_p1 = pnand %p2288_p8, %p3271_p12 }
 0x40f   : > { %p2294_p3 = por %p2293_p13, %p2292_p11 }
 0x410   : > { %p2290_p0 = pneg %p2289_p1 }
 0x411   : > { %p2296_p2 = por %p2295_p7, %p2294_p3 }
 0x413   : > { %p2297_p6 = pnand %p2296_p2, %p2290_p0 }
 0x415   : > { %2300 = shalt.err (!%p2297_p6)
}
 0x416   : > { %1969 = dma.vmem_to_hbm [thread:$0]  (%p3271_p12), %s1600_s26, 128, %s3075_s29, %s1576_s20  }
 0x417   : > { %s3272_s22 = sld [smem:[#allocation33_spill]]  ;;  %s536_s3 = scalar_lea.vmem [#allocation14], %s3048_s28 }
 0x418   : > { %s1612_s8 = sshll.u32 %s536_s3, 4  ;;  %s3273_s4 = sld [smem:[#allocation35_spill]]  ;;  %s3107_s8 = int_to_ptr.vmem [resolvable:$true] %s1612_s8 }
 0x419   : > { %s3111_s29 = scalar_lea.sflag [#allocation15], %s460_s12  ;;  %s2301_s26 = scalar_lea.vmem %s3107_s8, 128 }
 0x41a   : > { %p2302_p9 = scmp.ne.s32.totalorder %s3107_s8, %s2301_s26  ;;  %s2427_s20 = smov [#allocation14]  }
 0x41b   : > { %s2305_s25 = sshll.u32 %s2427_s20, 4  ;;  %s2306_s25 = int_to_ptr.vmem [resolvable:$false] %s2305_s25 }
 0x41c   : > { %p2303_p10 = pnand %p2302_p9, %p3271_p12  ;;  %s2307_s23 = scalar_lea.vmem %s2306_s25, 256 }
 0x41d   : > { %v1873_v12 = vld [vmem:[%s3272_s22] ss:$0 sm:$0xff]  ;;  %p2308_p5 = scmp.lt.s32.totalorder %s3107_s8, %s2306_s25  ;;  %p2309_p8 = scmp.lt.s32.totalorder %s2307_s23, %s2301_s26 }
 0x41e   : > { %s3105_s15 = scalar_lea.hbm %s3273_s4, %s3069_s1  ;;  %p2304_p4 = pneg %p2303_p10 }
 0x41f   : > { %p2310_p1 = por %p2309_p8, %p2308_p5 }
 0x421   : > { %p2311_p0 = pnand %p2310_p1, %p2304_p4 }
 0x4dc   : > { %v1563_v43 = vpop.f32.mrb[12].mxu1 }
 0x4dd   : > { %v1564_v40 = vadd.f32 %v1873_v12, %v1563_v43  ;;  %v1931_v1 = vpop.f32.mrb[13].mxu1 }
 0x4df   : > { %1567 = vst [vmem:[%s536_s3] sm:$0xff] %v1564_v40  ;;  %v1875_v52 = vmul.f32 -1.442695, %v1564_v40 }
 0x4e0   : > { %2314 = shalt.err (!%p2311_p0)
}
 0x4e1   : > { %s2315_s21 = scalar_lea.hbm %s3105_s15, 128  ;;  %s2319_s6 = scalar_lea.hbm %s3273_s4, 256 }
 0x4e2   : > { %p2316_p11 = scmp.ne.s32.totalorder %s3105_s15, %s2315_s21  ;;  %p2320_p7 = scmp.lt.u32.totalorder %s3105_s15, %s3273_s4 }
 0x4e3   : > { %p2321_p2 = scmp.lt.u32.totalorder %s2319_s6, %s2315_s21  ;;  %p2323_p9 = scmp.lt.u32.totalorder %s2315_s21, %s3105_s15 }
 0x4e4   : > { %p2317_p13 = pnand %p2316_p11, %p3271_p12 }
 0x4e5   : > { %p2322_p6 = por %p2321_p2, %p2320_p7 }
 0x4e6   : > { %p2318_p3 = pneg %p2317_p13 }
 0x4e7   : > { %p2324_p10 = por %p2323_p9, %p2322_p6 }
 0x4e9   : > { %p2325_p4 = pnand %p2324_p10, %p2318_p3 }
 0x4eb   : > { %2328 = shalt.err (!%p2325_p4)
}
 0x4ec   : > { %1970 = dma.vmem_to_hbm [thread:$0]  (%p3271_p12), %s3107_s8, 128, %s3105_s15, %s3111_s29   ;;  %2095 = vpow2.f32 %v1875_v52 }
 0x4ed   : > { %s543_s17 = scalar_lea.vmem [#allocation16], %s3048_s28  ;;  %s3274_s3 = sld [smem:[#allocation36_spill]] }
 0x4ee   : > { %s1625_s30 = sshll.u32 %s543_s17, 4  ;;  %s2428_s8 = smov [#allocation16]   ;;  %s3142_s30 = int_to_ptr.vmem [resolvable:$true] %s1625_s30 }
 0x4ef   : > { %s2329_s16 = scalar_lea.vmem %s3142_s30, 128  ;;  %s2333_s28 = sshll.u32 %s2428_s8, 4  ;;  %s2334_s28 = int_to_ptr.vmem [resolvable:$false] %s2333_s28 }
 0x4f0   : > { %p2330_p5 = scmp.ne.s32.totalorder %s3142_s30, %s2329_s16  ;;  %s2335_s15 = scalar_lea.vmem %s2334_s28, 256 }
 0x4f1   : > { %p2336_p0 = scmp.lt.s32.totalorder %s3142_s30, %s2334_s28  ;;  %p2337_p11 = scmp.lt.s32.totalorder %s2335_s15, %s2329_s16 }
 0x4f2   : > { %p2331_p8 = pnand %p2330_p5, %p3271_p12 }
 0x4f3   : > { %s3140_s13 = scalar_lea.hbm %s3274_s3, %s3069_s1  ;;  %p2338_p13 = por %p2337_p11, %p2336_p0 }
 0x4f4   : > { %p2332_p1 = pneg %p2331_p8 }
 0x4f6   : > { %v2096_v48 = vpop.eup %2095  ;;  %p2339_p3 = pnand %p2338_p13, %p2332_p1 }
 0x4f7   : > { %v1571_v17 = vadd.f32 1.0, %v2096_v48 }
 0x4f9   : > { %2097 = vrcp.f32 %v1571_v17 }
 0x503   : > { %v2098_v53 = vpop.eup %2097 }
 0x504   : > { %1574 = vst [vmem:[%s543_s17] sm:$0xff] %v2098_v53 }
 0x505   : > { %2342 = shalt.err (!%p2339_p3)
}
 0x506   : > { %s2343_s1 = scalar_lea.hbm %s3140_s13, 128  ;;  %s2347_s25 = scalar_lea.hbm %s3274_s3, 256 }
 0x507   : > { %p2344_p7 = scmp.ne.s32.totalorder %s3140_s13, %s2343_s1  ;;  %p2348_p9 = scmp.lt.u32.totalorder %s3140_s13, %s3274_s3 }
 0x508   : > { %p2349_p10 = scmp.lt.u32.totalorder %s2347_s25, %s2343_s1  ;;  %p2351_p5 = scmp.lt.u32.totalorder %s2343_s1, %s3140_s13 }
 0x509   : > { %p2345_p2 = pnand %p2344_p7, %p3271_p12 }
 0x50a   : > { %p2350_p4 = por %p2349_p10, %p2348_p9 }
 0x50b   : > { %p2346_p6 = pneg %p2345_p2 }
 0x50c   : > { %p2352_p8 = por %p2351_p5, %p2350_p4 }
 0x50e   : > { %p2353_p1 = pnand %p2352_p8, %p2346_p6 }
 0x510   : > { %2356 = shalt.err (!%p2353_p1)
}
 0x511   : > { %1971 = dma.vmem_to_hbm [thread:$0]  (%p3271_p12), %s3142_s30, 128, %s3140_s13, %s3111_s29  }
 0x512 PF: > { %s3275_s12 = sld [smem:[#allocation23_spill]]  ;;  %s3276_s27 = sld [smem:[#allocation28_spill]] }
 0x513   : > { %s3277_s6 = sld [smem:[#allocation24_spill]] }
 0x518   : > { %s1637_s9 = sand.u32 1, %s3275_s12   ;;  %p3278_p0 = scmp.ne.s32.totalorder %s3276_s27, 0 }
 0x519   : > { %p3279_p11 = scmp.ge.s32.totalorder %s3277_s6, 2  ;;  %s1638_s14 = scalar_lea.sflag [#allocation4], %s1637_s9 }
 0x51b   : > { %p1996_p13 = pnand %p3279_p11, %p3278_p0 }
 0x51d   : > { %2390 = dma.done.wait (!%p1996_p13), %s1638_s14, 128  }
 0x51e   : > { %2392 = vsyncadd (!%p1996_p13), %s1638_s14, 4294967168  ;;  %s3280_s17 = sadd.s32 4294967294, %s3277_s6  }
 0x51f   : > { %s1646_s11 = sand.u32 1, %s3280_s17  }
 0x520   : > { %s1647_s22 = scalar_lea.sflag [#allocation15], %s1646_s11 }
 0x521   : > { %2394 = dma.done.wait (!%p1996_p13), %s1647_s22, 256  }
 0x522   : > { %2396 = vsyncadd (!%p1996_p13), %s1647_s22, 4294967040  ;;  %s3281_s20 = sld [smem:[#allocation25_spill]]  ;;  %s3282_s10 = sld [smem:[#allocation26_spill]] }
 0x523   : > { %s3283_s17 = smov %s2403_s18  ;;  %s3284_s18 = smov %s2407_s19 }
 0x528   : > { %p33_p12 = scmp.ge.s32.totalorder %s3281_s20, 4   ;;  %s3285_s19 = smov %s3282_s10 }
 0x52a   :  { %35 = sbr.rel (!%p33_p12) target bundleno = 20 (0x14), region = 169 }
 0x531   :  { %1661 = vsyncpa [#allocation3], 1 }
 0x532   :  { %1663 = vsyncpa [#allocation3 + $0x1], 1 }
 0x533   :  { %1664 = vsyncpa [#allocation6], 1 }
 0x534   :  { %1666 = vsyncpa [#allocation6 + $0x1], 1 }
 0x535   :  { %1667 = vsyncpa [#allocation9], 1 }
 0x536   :  { %1668 = vsyncpa [#allocation12], 1 }
 0x537   :  { %1669 = vsyncpa [#allocation4], 1 }
 0x538   :  { %1671 = vsyncpa [#allocation4 + $0x1], 1 }
 0x539   :  { %1672 = vsyncpa [#allocation15], 1 }
 0x53a   :  { %1674 = vsyncpa [#allocation15 + $0x1], 1 }

</bundles_post_ra>
